<compile_context>
chip_gen: v7x
topology: tpu7x:2x2x1
jax: 0.10.0
libtpu: 0.0.40
codegen_flags: <defaults>
</compile_context>

<pallas_src>
import functools

import jax
import jax.numpy as jnp
from jax.experimental import pallas as pl
from jax.experimental.pallas import tpu as pltpu


def attention_kernel(mask_ref, w_ref, x_ref, s_ref, o_ref, *, width, depthwise,
                     conv_dtype):
    """One (batch, channel-block) grid step.

    mask_ref: (9, HW)        0/1 border-validity mask per 3x3 tap (conv_dtype)
    w_ref:    (1, CB, 9*CB)  block-diagonal grouped-conv weights  (MXU path)
              (1, CB, 9)     per-channel tap weights              (depthwise path)
    x_ref:    (1, CB, HW)
    s_ref:    (1, CB, HW)    skip
    o_ref:    (1, CB, HW)
    """
    s_raw = s_ref[0]                              # (CB, HW)
    sc = s_raw.astype(conv_dtype)
    hw = sc.shape[-1]

    # Shifted-and-zero-padded 3x3 taps of `skip`, built with lane rotations (XLU)
    # plus a border mask -- no padded scratch copy, no unaligned slices.
    taps = []
    k = 0
    for dy in (-1, 0, 1):
        for dx in (-1, 0, 1):
            d = dy * width + dx                   # flattened source offset
            if d == 0:
                taps.append(sc)
            else:
                t = pltpu.roll(sc, shift=(-d) % hw, axis=1)
                taps.append(t * mask_ref[k:k + 1, :])
            k += 1

    if depthwise:
        # channels_per_group == 1: 9 lane-dense VPU broadcast-MACs; a block-diag
        # MXU matmul would spend `groups`x the FLOPs multiplying zeros.
        conv = taps[0].astype(jnp.float32) * w_ref[0, :, 0:1].astype(jnp.float32)
        for kk in range(1, 9):
            conv = conv + (taps[kk].astype(jnp.float32) *
                           w_ref[0, :, kk:kk + 1].astype(jnp.float32))
    else:
        # im2col: one (CB, 9*CB) @ (9*CB, HW) MXU matmul, f32 accumulate.
        patches = jnp.concatenate(taps, axis=0)              # (9*CB, HW)
        conv = jnp.dot(w_ref[0], patches,
                       preferred_element_type=jnp.float32)   # (CB, HW) f32

    f = jax.nn.sigmoid(conv)
    xv = x_ref[0].astype(jnp.float32)
    sv = s_raw.astype(jnp.float32)
    # x*f + skip*(1-f) == skip + f*(x - skip)
    o_ref[0] = (sv + f * (xv - sv)).astype(o_ref.dtype)


def _build_border_masks(H, W, dtype):
    """(9, H*W) {0,1} mask: mask[k, y*W+x] == 1 iff the source pixel (y+dy, x+dx)
    of tap k = (dy+1)*3 + (dx+1) lies inside the image (SAME zero padding)."""
    yy = jnp.arange(H)[:, None]
    xx = jnp.arange(W)[None, :]
    rows = []
    for dy in (-1, 0, 1):
        for dx in (-1, 0, 1):
            valid = ((yy + dy >= 0) & (yy + dy < H) &
                     (xx + dx >= 0) & (xx + dx < W))
            rows.append(valid.reshape(-1))
    return jnp.stack(rows).astype(dtype)


def _build_blockdiag_weights(weight, groups, block_c, dtype):
    """PyTorch (C, C//groups, 3, 3) grouped-conv weight ->
    (C//block_c, block_c, 9*block_c) block-diagonal per-channel-block matrices:
      conv[co, :] = sum_{k, ci} Wblk[co, k*CB + ci] * tap_k[ci, :]."""
    C, cpg, KH, KW = weight.shape
    n_taps = KH * KW
    w9 = jnp.transpose(weight, (0, 2, 3, 1)).reshape(C, n_taps, cpg)   # [co, k, j]
    co = jnp.arange(C)[:, None, None]
    kk = jnp.arange(n_taps)[None, :, None]
    ci = (jnp.arange(C)[:, None, None] // cpg) * cpg + jnp.arange(cpg)[None, None, :]
    wfull = jnp.zeros((C, n_taps, C), dtype).at[co, kk, ci].set(w9.astype(dtype))
    nb = C // block_c
    blocks = [wfull[b * block_c:(b + 1) * block_c, :,
                    b * block_c:(b + 1) * block_c].reshape(block_c, n_taps * block_c)
              for b in range(nb)]
    return jnp.stack(blocks)                                           # (nb, CB, 9*CB)


def _build_depthwise_weights(weight, block_c, dtype):
    """(C, 1, 3, 3) depthwise weight -> (C//block_c, block_c, 9)."""
    C = weight.shape[0]
    w9 = weight.reshape(C, 9).astype(dtype)
    return w9.reshape(C // block_c, block_c, 9)


def _pick_block_c(C, cpg, HW, io_itemsize, conv_itemsize,
                  budget_bytes=32 * 1024 * 1024):
    """Largest group-aligned divisor CB of C whose per-step footprint
    (double-buffered x/skip/out blocks + the 9-tap patch stack) fits the budget."""
    best = cpg
    for cb in range(cpg, C + 1, cpg):
        if C % cb:
            continue
        footprint = cb * HW * (6 * io_itemsize + 10 * conv_itemsize)
        if footprint <= budget_bytes:
            best = cb
    return best


def attention_layer(x, skip, weight, groups, *, block_c=None, conv_dtype=None,
                    vmem_limit_mb=48):
    """AttentionLayer forward.  x, skip: (N, C, H, W) NCHW;
    weight: (C, C//groups, 3, 3) (PyTorch Conv2d layout, bias=False).

    conv_dtype: dtype fed to the MXU for the conv (jnp.bfloat16 on v6e/v7x models);
    defaults to x.dtype.  block_c: channels per grid step (group-aligned divisor of
    C), auto-picked from a VMEM budget if None.  vmem_limit_mb: ~40-48 on v7x
    (64 MiB VMEM), 64-96 is fine on v5e/v6e (128 MiB)."""
    N, C, H, W = x.shape
    if skip.shape != x.shape:
        raise ValueError("x and skip must have the same shape")
    Cw, cpg, KH, KW = weight.shape
    if Cw != C or KH != 3 or KW != 3 or C % groups != 0 or cpg != C // groups:
        raise ValueError("weight must be (C, C//groups, 3, 3)")
    HW = H * W
    if conv_dtype is None:
        conv_dtype = x.dtype
    conv_dtype = jnp.dtype(conv_dtype)

    depthwise = (cpg == 1)
    if block_c is None:
        block_c = _pick_block_c(C, cpg, HW, x.dtype.itemsize, conv_dtype.itemsize)
    if C % block_c or block_c % cpg:
        raise ValueError("block_c must be a group-aligned divisor of C")
    nb = C // block_c

    x2 = x.reshape(N, C, HW)       # contiguous reshapes: free, no transpose glue
    s2 = skip.reshape(N, C, HW)
    mask = _build_border_masks(H, W, conv_dtype)
    if depthwise:
        wall = _build_depthwise_weights(weight, block_c, conv_dtype)
        w_spec = pl.BlockSpec((1, block_c, 9), lambda n, c: (c, 0, 0))
    else:
        wall = _build_blockdiag_weights(weight, groups, block_c, conv_dtype)
        w_spec = pl.BlockSpec((1, block_c, 9 * block_c), lambda n, c: (c, 0, 0))

    row_spec = pl.BlockSpec((1, block_c, HW), lambda n, c: (n, c, 0))

    out = pl.pallas_call(
        functools.partial(attention_kernel, width=W, depthwise=depthwise,
                          conv_dtype=conv_dtype),
        out_shape=jax.ShapeDtypeStruct((N, C, HW), x.dtype),
        grid_spec=pltpu.PrefetchScalarGridSpec(
            num_scalar_prefetch=0,
            grid=(N, nb),
            in_specs=[
                pl.BlockSpec((9, HW), lambda n, c: (0, 0)),   # border masks
                w_spec,                                        # conv weights
                row_spec,                                      # x
                row_spec,                                      # skip
            ],
            out_specs=row_spec,
        ),
        compiler_params=pltpu.CompilerParams(
            dimension_semantics=("parallel", "parallel"),
            vmem_limit_bytes=vmem_limit_mb * 1024 * 1024),
    )(mask, wall, x2, s2)
    return out.reshape(N, C, H, W)


def reference(x, skip, weight, groups):
    conv = jax.lax.conv_general_dilated(
        skip, weight, window_strides=(1, 1), padding="SAME",
        dimension_numbers=("NCHW", "OIHW", "NCHW"),
        feature_group_count=groups)
    f = jax.nn.sigmoid(conv)
    return x * f + skip * (1.0 - f)


if __name__ == "__main__":
    N, C, H, W = 2, 32, 16, 16
    key = jax.random.PRNGKey(0)
    kx, ks, kw1, kw2 = jax.random.split(key, 4)
    x = jax.random.normal(kx, (N, C, H, W), dtype=jnp.float32)
    skip = jax.random.normal(ks, (N, C, H, W), dtype=jnp.float32)

    # Config 1: module defaults (groups=32 -> channels_per_group == 1):
    # exercises the depthwise VPU broadcast-MAC path.
    g1 = 32
    w1 = jax.random.normal(kw1, (C, C // g1, 3, 3), dtype=jnp.float32) * 0.1
    ref1 = reference(x, skip, w1, g1)
    out1 = jax.block_until_ready(attention_layer(x, skip, w1, g1))
    assert out1.shape == (N, C, H, W)
    assert jnp.allclose(out1, ref1, atol=1e-4, rtol=1e-4), "mismatch (groups=32)"

    # Config 2: groups=8 (channels_per_group=4): exercises the single im2col MXU
    # matmul path with an explicit 16-channel block so the C grid axis is > 1.
    g2 = 8
    w2 = jax.random.normal(kw2, (C, C // g2, 3, 3), dtype=jnp.float32) * 0.1
    ref2 = reference(x, skip, w2, g2)
    out2 = jax.block_until_ready(attention_layer(x, skip, w2, g2, block_c=16))
    assert jnp.allclose(out2, ref2, atol=1e-4, rtol=1e-4), "mismatch (groups=8)"

    # Config 3: same weights, bf16 MXU operands (native MXU input on v6e/v7x).
    out3 = jax.block_until_ready(
        attention_layer(x, skip, w2, g2, conv_dtype=jnp.bfloat16))
    assert jnp.allclose(out3, ref2, atol=5e-2, rtol=5e-2), "mismatch (bf16 conv)"

    print("KERNEL_OK")
</pallas_src>

<mosaic_0001>
module attributes {stable_mosaic.version = 11 : i64} {
  func.func @attention_kernel(%arg0: i32, %arg1: i32, %arg2: memref<9x256xf32, #tpu.memory_space<vmem>>, %arg3: memref<1x32x9xf32, #tpu.memory_space<vmem>>, %arg4: memref<1x32x256xf32, #tpu.memory_space<vmem>>, %arg5: memref<1x32x256xf32, #tpu.memory_space<vmem>>, %arg6: memref<1x32x256xf32, #tpu.memory_space<vmem>>) attributes {dimension_semantics = [#tpu.dimension_semantics<parallel>, #tpu.dimension_semantics<parallel>], iteration_bounds = array<i64: 2, 1>, scalar_prefetch = 0 : i64, scratch_operands = 0 : i64, tpu.core_type = #tpu.core_type<tc>, window_params = [{pipeline_mode = #tpu.pipeline_mode<synchronous>, transform_indices = @transform_0, window_bounds = array<i64: 9, 256>}, {transform_indices = @transform_1, window_bounds = array<i64: 1, 32, 9>}, {transform_indices = @transform_2, window_bounds = array<i64: 1, 32, 256>}, {transform_indices = @transform_3, window_bounds = array<i64: 1, 32, 256>}, {transform_indices = @transform_4, window_bounds = array<i64: 1, 32, 256>}]} {
    %c0 = arith.constant 0 : index
    %c0_0 = arith.constant 0 : index
    %c0_1 = arith.constant 0 : index
    %0 = vector.load %arg5[%c0, %c0_0, %c0_1] : memref<1x32x256xf32, #tpu.memory_space<vmem>>, vector<1x32x256xf32>
    %1 = vector.shape_cast %0 : vector<1x32x256xf32> to vector<32x256xf32>
    %c17_i32 = arith.constant 17 : i32
    %2 = tpu.dynamic_rotate %1 by %c17_i32 dim 1 : vector<32x256xf32>, i32 -> vector<32x256xf32>
    %c0_2 = arith.constant 0 : index
    %c0_3 = arith.constant 0 : index
    %3 = vector.load %arg2[%c0_2, %c0_3] : memref<9x256xf32, #tpu.memory_space<vmem>>, vector<1x256xf32>
    %4 = vector.broadcast %3 : vector<1x256xf32> to vector<32x256xf32>
    %5 = arith.mulf %2, %4 : vector<32x256xf32>
    %c16_i32 = arith.constant 16 : i32
    %6 = tpu.dynamic_rotate %1 by %c16_i32 dim 1 : vector<32x256xf32>, i32 -> vector<32x256xf32>
    %c1 = arith.constant 1 : index
    %c0_4 = arith.constant 0 : index
    %7 = vector.load %arg2[%c1, %c0_4] : memref<9x256xf32, #tpu.memory_space<vmem>>, vector<1x256xf32>
    %8 = vector.broadcast %7 : vector<1x256xf32> to vector<32x256xf32>
    %9 = arith.mulf %6, %8 : vector<32x256xf32>
    %c15_i32 = arith.constant 15 : i32
    %10 = tpu.dynamic_rotate %1 by %c15_i32 dim 1 : vector<32x256xf32>, i32 -> vector<32x256xf32>
    %c2 = arith.constant 2 : index
    %c0_5 = arith.constant 0 : index
    %11 = vector.load %arg2[%c2, %c0_5] : memref<9x256xf32, #tpu.memory_space<vmem>>, vector<1x256xf32>
    %12 = vector.broadcast %11 : vector<1x256xf32> to vector<32x256xf32>
    %13 = arith.mulf %10, %12 : vector<32x256xf32>
    %c1_i32 = arith.constant 1 : i32
    %14 = tpu.dynamic_rotate %1 by %c1_i32 dim 1 : vector<32x256xf32>, i32 -> vector<32x256xf32>
    %c3 = arith.constant 3 : index
    %c0_6 = arith.constant 0 : index
    %15 = vector.load %arg2[%c3, %c0_6] : memref<9x256xf32, #tpu.memory_space<vmem>>, vector<1x256xf32>
    %16 = vector.broadcast %15 : vector<1x256xf32> to vector<32x256xf32>
    %17 = arith.mulf %14, %16 : vector<32x256xf32>
    %c255_i32 = arith.constant 255 : i32
    %18 = tpu.dynamic_rotate %1 by %c255_i32 dim 1 : vector<32x256xf32>, i32 -> vector<32x256xf32>
    %c5 = arith.constant 5 : index
    %c0_7 = arith.constant 0 : index
    %19 = vector.load %arg2[%c5, %c0_7] : memref<9x256xf32, #tpu.memory_space<vmem>>, vector<1x256xf32>
    %20 = vector.broadcast %19 : vector<1x256xf32> to vector<32x256xf32>
    %21 = arith.mulf %18, %20 : vector<32x256xf32>
    %c241_i32 = arith.constant 241 : i32
    %22 = tpu.dynamic_rotate %1 by %c241_i32 dim 1 : vector<32x256xf32>, i32 -> vector<32x256xf32>
    %c6 = arith.constant 6 : index
    %c0_8 = arith.constant 0 : index
    %23 = vector.load %arg2[%c6, %c0_8] : memref<9x256xf32, #tpu.memory_space<vmem>>, vector<1x256xf32>
    %24 = vector.broadcast %23 : vector<1x256xf32> to vector<32x256xf32>
    %25 = arith.mulf %22, %24 : vector<32x256xf32>
    %c240_i32 = arith.constant 240 : i32
    %26 = tpu.dynamic_rotate %1 by %c240_i32 dim 1 : vector<32x256xf32>, i32 -> vector<32x256xf32>
    %c7 = arith.constant 7 : index
    %c0_9 = arith.constant 0 : index
    %27 = vector.load %arg2[%c7, %c0_9] : memref<9x256xf32, #tpu.memory_space<vmem>>, vector<1x256xf32>
    %28 = vector.broadcast %27 : vector<1x256xf32> to vector<32x256xf32>
    %29 = arith.mulf %26, %28 : vector<32x256xf32>
    %c239_i32 = arith.constant 239 : i32
    %30 = tpu.dynamic_rotate %1 by %c239_i32 dim 1 : vector<32x256xf32>, i32 -> vector<32x256xf32>
    %c8 = arith.constant 8 : index
    %c0_10 = arith.constant 0 : index
    %31 = vector.load %arg2[%c8, %c0_10] : memref<9x256xf32, #tpu.memory_space<vmem>>, vector<1x256xf32>
    %32 = vector.broadcast %31 : vector<1x256xf32> to vector<32x256xf32>
    %33 = arith.mulf %30, %32 : vector<32x256xf32>
    %c0_11 = arith.constant 0 : index
    %c0_12 = arith.constant 0 : index
    %c0_13 = arith.constant 0 : index
    %34 = vector.load %arg3[%c0_11, %c0_12, %c0_13] : memref<1x32x9xf32, #tpu.memory_space<vmem>>, vector<1x32x1xf32>
    %35 = vector.shape_cast %34 : vector<1x32x1xf32> to vector<32x1xf32>
    %36 = vector.broadcast %35 : vector<32x1xf32> to vector<32x256xf32>
    %37 = arith.mulf %5, %36 : vector<32x256xf32>
    %c0_14 = arith.constant 0 : index
    %c0_15 = arith.constant 0 : index
    %c1_16 = arith.constant 1 : index
    %38 = vector.load %arg3[%c0_14, %c0_15, %c1_16] : memref<1x32x9xf32, #tpu.memory_space<vmem>>, vector<1x32x1xf32>
    %39 = vector.shape_cast %38 : vector<1x32x1xf32> to vector<32x1xf32>
    %40 = vector.broadcast %39 : vector<32x1xf32> to vector<32x256xf32>
    %41 = arith.mulf %9, %40 : vector<32x256xf32>
    %42 = arith.addf %37, %41 : vector<32x256xf32>
    %c0_17 = arith.constant 0 : index
    %c0_18 = arith.constant 0 : index
    %c2_19 = arith.constant 2 : index
    %43 = vector.load %arg3[%c0_17, %c0_18, %c2_19] : memref<1x32x9xf32, #tpu.memory_space<vmem>>, vector<1x32x1xf32>
    %44 = vector.shape_cast %43 : vector<1x32x1xf32> to vector<32x1xf32>
    %45 = vector.broadcast %44 : vector<32x1xf32> to vector<32x256xf32>
    %46 = arith.mulf %13, %45 : vector<32x256xf32>
    %47 = arith.addf %42, %46 : vector<32x256xf32>
    %c0_20 = arith.constant 0 : index
    %c0_21 = arith.constant 0 : index
    %c3_22 = arith.constant 3 : index
    %48 = vector.load %arg3[%c0_20, %c0_21, %c3_22] : memref<1x32x9xf32, #tpu.memory_space<vmem>>, vector<1x32x1xf32>
    %49 = vector.shape_cast %48 : vector<1x32x1xf32> to vector<32x1xf32>
    %50 = vector.broadcast %49 : vector<32x1xf32> to vector<32x256xf32>
    %51 = arith.mulf %17, %50 : vector<32x256xf32>
    %52 = arith.addf %47, %51 : vector<32x256xf32>
    %c0_23 = arith.constant 0 : index
    %c0_24 = arith.constant 0 : index
    %c4 = arith.constant 4 : index
    %53 = vector.load %arg3[%c0_23, %c0_24, %c4] : memref<1x32x9xf32, #tpu.memory_space<vmem>>, vector<1x32x1xf32>
    %54 = vector.shape_cast %53 : vector<1x32x1xf32> to vector<32x1xf32>
    %55 = vector.broadcast %54 : vector<32x1xf32> to vector<32x256xf32>
    %56 = arith.mulf %1, %55 : vector<32x256xf32>
    %57 = arith.addf %52, %56 : vector<32x256xf32>
    %c0_25 = arith.constant 0 : index
    %c0_26 = arith.constant 0 : index
    %c5_27 = arith.constant 5 : index
    %58 = vector.load %arg3[%c0_25, %c0_26, %c5_27] : memref<1x32x9xf32, #tpu.memory_space<vmem>>, vector<1x32x1xf32>
    %59 = vector.shape_cast %58 : vector<1x32x1xf32> to vector<32x1xf32>
    %60 = vector.broadcast %59 : vector<32x1xf32> to vector<32x256xf32>
    %61 = arith.mulf %21, %60 : vector<32x256xf32>
    %62 = arith.addf %57, %61 : vector<32x256xf32>
    %c0_28 = arith.constant 0 : index
    %c0_29 = arith.constant 0 : index
    %c6_30 = arith.constant 6 : index
    %63 = vector.load %arg3[%c0_28, %c0_29, %c6_30] : memref<1x32x9xf32, #tpu.memory_space<vmem>>, vector<1x32x1xf32>
    %64 = vector.shape_cast %63 : vector<1x32x1xf32> to vector<32x1xf32>
    %65 = vector.broadcast %64 : vector<32x1xf32> to vector<32x256xf32>
    %66 = arith.mulf %25, %65 : vector<32x256xf32>
    %67 = arith.addf %62, %66 : vector<32x256xf32>
    %c0_31 = arith.constant 0 : index
    %c0_32 = arith.constant 0 : index
    %c7_33 = arith.constant 7 : index
    %68 = vector.load %arg3[%c0_31, %c0_32, %c7_33] : memref<1x32x9xf32, #tpu.memory_space<vmem>>, vector<1x32x1xf32>
    %69 = vector.shape_cast %68 : vector<1x32x1xf32> to vector<32x1xf32>
    %70 = vector.broadcast %69 : vector<32x1xf32> to vector<32x256xf32>
    %71 = arith.mulf %29, %70 : vector<32x256xf32>
    %72 = arith.addf %67, %71 : vector<32x256xf32>
    %c0_34 = arith.constant 0 : index
    %c0_35 = arith.constant 0 : index
    %c8_36 = arith.constant 8 : index
    %73 = vector.load %arg3[%c0_34, %c0_35, %c8_36] : memref<1x32x9xf32, #tpu.memory_space<vmem>>, vector<1x32x1xf32>
    %74 = vector.shape_cast %73 : vector<1x32x1xf32> to vector<32x1xf32>
    %75 = vector.broadcast %74 : vector<32x1xf32> to vector<32x256xf32>
    %76 = arith.mulf %33, %75 : vector<32x256xf32>
    %77 = arith.addf %72, %76 : vector<32x256xf32>
    %78 = arith.negf %77 : vector<32x256xf32>
    %79 = math.exp %78 : vector<32x256xf32>
    %cst = arith.constant 1.000000e+00 : f32
    %80 = vector.broadcast %cst : f32 to vector<32x256xf32>
    %81 = arith.addf %80, %79 : vector<32x256xf32>
    %82 = arith.divf %80, %81 : vector<32x256xf32>
    %c0_37 = arith.constant 0 : index
    %c0_38 = arith.constant 0 : index
    %c0_39 = arith.constant 0 : index
    %83 = vector.load %arg4[%c0_37, %c0_38, %c0_39] : memref<1x32x256xf32, #tpu.memory_space<vmem>>, vector<1x32x256xf32>
    %84 = vector.shape_cast %83 : vector<1x32x256xf32> to vector<32x256xf32>
    %85 = arith.subf %84, %1 : vector<32x256xf32>
    %86 = arith.mulf %82, %85 : vector<32x256xf32>
    %87 = arith.addf %1, %86 : vector<32x256xf32>
    %c0_40 = arith.constant 0 : index
    %c0_41 = arith.constant 0 : index
    %c0_42 = arith.constant 0 : index
    %88 = vector.load %arg6[%c0_40, %c0_41, %c0_42] : memref<1x32x256xf32, #tpu.memory_space<vmem>>, vector<1x32x256xf32>
    %89 = vector.shape_cast %88 : vector<1x32x256xf32> to vector<32x256xf32>
    %90 = vector.shape_cast %87 : vector<32x256xf32> to vector<1x32x256xf32>
    tpu.vector_store %arg6[%c0_40, %c0_41, %c0_42], %90 {strides = array<i32>} : memref<1x32x256xf32, #tpu.memory_space<vmem>>, vector<1x32x256xf32>,
    return
  }
  func.func @transform_0(%arg0: i32, %arg1: i32) -> (i32, i32) {
    %c0_i32 = arith.constant 0 : i32
    %c0_i32_0 = arith.constant 0 : i32
    %c0_i32_1 = arith.constant 0 : i32
    return %c0_i32, %c0_i32_0 : i32, i32
  }
  func.func @transform_1(%arg0: i32, %arg1: i32) -> (i32, i32, i32) {
    %c0_i32 = arith.constant 0 : i32
    %c0_i32_0 = arith.constant 0 : i32
    %c0_i32_1 = arith.constant 0 : i32
    return %arg1, %c0_i32, %c0_i32_0 : i32, i32, i32
  }
  func.func @transform_2(%arg0: i32, %arg1: i32) -> (i32, i32, i32) {
    %c0_i32 = arith.constant 0 : i32
    %c0_i32_0 = arith.constant 0 : i32
    return %arg0, %arg1, %c0_i32 : i32, i32, i32
  }
  func.func @transform_3(%arg0: i32, %arg1: i32) -> (i32, i32, i32) {
    %c0_i32 = arith.constant 0 : i32
    %c0_i32_0 = arith.constant 0 : i32
    return %arg0, %arg1, %c0_i32 : i32, i32, i32
  }
  func.func @transform_4(%arg0: i32, %arg1: i32) -> (i32, i32, i32) {
    %c0_i32 = arith.constant 0 : i32
    %c0_i32_0 = arith.constant 0 : i32
    return %arg0, %arg1, %c0_i32 : i32, i32, i32
  }
}

</mosaic_0001>

<bundles_post_ra>
// kernel: tpu_custom_call.1
= control target key start
LH: loop header
LB: loop body
LE: loop exit
PB: predicated region body
PF: predicated region fallthrough
CT: control target
= control target key end

     0   :  { %9 = vsyncpa [#allocation3], 0  ;;  %s2369_s0 = inlined_call_operand.vmem [shape: f32[9,256], index: 0, kind: input, shape index: {}]   ;;  %s2370_s1 = inlined_call_operand.vmem [shape: f32[1,32,9], index: 1, kind: input, shape index: {}]   ;;  %s2371_s2 = inlined_call_operand.hbm [shape: f32[2,32,256], index: 2, kind: input, shape index: {}]   ;;  %s2372_s3 = inlined_call_operand.hbm [shape: f32[2,32,256], index: 3, kind: input, shape index: {}]   ;;  %s2373_s4 = inlined_call_operand.hbm [shape: f32[2,32,256], index: 4, kind: output, shape index: {}]  }
   0x1   :  { %11 = vsyncpa [#allocation3 + $0x1], 0 }
   0x2   :  { %12 = vsyncpa [#allocation6], 0 }
   0x3   :  { %14 = vsyncpa [#allocation6 + $0x1], 0 }
   0x4   :  { %15 = vsyncpa [#allocation4], 0 }
   0x5   :  { %17 = vsyncpa [#allocation4 + $0x1], 0  ;;  %s1580_s15 = smov 0   ;;  %s1582_s16 = smov 0  }
   0x6   :  { %s1584_s17 = smov 0   ;;  %s1586_s18 = smov 0  }
   0x7   :  { %s1588_s19 = smov 0   ;;  %s1590_s20 = smov 0  }
   0x8 LB: > { %s1201_s21 = sadd.s32 4294967295, %s1530_s20   ;;  %s1202_s22 = sadd.s32 4294967294, %s1530_s20   ;;  %s1530_s20 = sphi %s1590_s20, %s23_s20   ;;  %s1526_s19 = sphi %s1588_s19, %s2467_s19   ;;  %s1522_s18 = sphi %s1586_s18, %s2466_s18   ;;  %s1518_s17 = sphi %s1584_s17, %s2465_s17   ;;  %s1514_s16 = sphi %s1582_s16, %s2464_s16   ;;  %s1510_s15 = sphi %s1580_s15, %s2463_s15  }
   0x9   : > { %s35_s23 = sadd.s32 1, %s1526_s19  ;;  %s91_s24 = sadd.s32 1, %s1518_s17 }
   0xa   : > { %p37_p0 = scmp.ge.s32.totalorder %s35_s23, 2  ;;  %p98_p1 = scmp.ne.s32.totalorder %s1518_s17, %s1514_s16 }
   0xb   : > { %p99_p2 = scmp.eq.s32.totalorder %s1530_s20, 0  ;;  %p104_p3 = scmp.ne.s32.totalorder %s1514_s16, %s1510_s15 }
   0xc   : > { %s2469_s23 = smov (%p37_p0, %s35_s23), 0  ;;  %p105_p5 = scmp.eq.s32.totalorder %s1201_s21, 0 }
   0xd   : > { %p1621_p4 = por %p99_p2, %p98_p1  ;;  %s86_s26 = ssub.s32 %s1526_s19, %s2469_s23 }
   0xe   : > { %p158_p6 = scmp.eq.s32.totalorder %s1201_s21, 1  ;;  %p89_p7 = scmp.eq.s32.totalorder %s86_s26, 0 }
   0xf   : > { %p1627_p8 = por %p105_p5, %p104_p3  ;;  %p164_p10 = scmp.eq.s32.totalorder %s1202_s22, 1 }
  0x10   : > { %p1631_p9 = por %p158_p6, %p98_p1  ;;  %p1256_p13 = scmp.lt.s32.totalorder %s1530_s20, 2 }
  0x11   : > { %s2385_s27 = scalar_select %p1627_p8, 1, 0 }
  0x12   : > { %s2386_s28 = scalar_select %p1631_p9, 1, 0 }
  0x13   : > { %s1636_s29 = scalar_select %p89_p7, %s1518_s17, %s91_s24  }
  0x14   : > { %p1638_p11 = por %p164_p10, %p104_p3  ;;  %s1645_s5 = sand.u32 1, %s1518_s17  }
  0x15   : > { %s1206_s6 = sshll.u32 %s1645_s5, 6  ;;  %s1236_s7 = sshll.u32 %s1526_s19, 10 }
  0x16   : > { %s2387_s30 = scalar_select %p1638_p11, 1, 0 }
  0x17   : > { %s1654_s10 = scalar_lea.hbm %s2371_s2, %s1236_s7  ;;  %s199_s11 = scalar_lea.vmem [#allocation2], %s1206_s6 }
  0x18   : > { %s209_s12 = sshll.u32 %s199_s11, 4  ;;  %p1662_p0 = pnand %p1256_p13, %p1621_p4  ;;  %s1658_s12 = int_to_ptr.vmem [resolvable:$true] %s209_s12 }
  0x19   : > { %s196_s14 = scalar_lea.sflag [#allocation3], %s1645_s5  ;;  %s1384_s21 = scalar_lea.hbm %s1654_s10, 1024 }
  0x1a   : > { %p1385_p2 = scmp.ne.s32.totalorder %s1654_s10, %s1384_s21  ;;  %p1386_p3 = pneg %p1662_p0 }
  0x1b   : > { %s1389_s25 = scalar_lea.hbm %s2371_s2, 2048  ;;  %p1390_p4 = scmp.lt.u32.totalorder %s1654_s10, %s2371_s2 }
  0x1c   : > { %p1387_p5 = pnand %p1386_p3, %p1385_p2  ;;  %p1391_p7 = scmp.lt.u32.totalorder %s1389_s25, %s1384_s21 }
  0x1d   : > { %p1393_p13 = scmp.lt.u32.totalorder %s1384_s21, %s1654_s10 }
  0x1e   : > { %p1388_p6 = pneg %p1387_p5  ;;  %p1392_p10 = por %p1391_p7, %p1390_p4 }
  0x20   : > { %p1394_p12 = por %p1393_p13, %p1392_p10 }
  0x22   : > { %p1395_p1 = pnand %p1394_p12, %p1388_p6 }
  0x24   : > { %1398 = shalt.err (!%p1395_p1)
}
  0x25   : > { %s1399_s9 = scalar_lea.vmem %s1658_s12, 1024  ;;  %s1532_s11 = smov [#allocation2]  }
  0x26   : > { %p1400_p2 = scmp.ne.s32.totalorder %s1658_s12, %s1399_s9  ;;  %s1404_s22 = sshll.u32 %s1532_s11, 4  ;;  %s1405_s22 = int_to_ptr.vmem [resolvable:$false] %s1404_s22 }
  0x27   : > { %s1406_s24 = scalar_lea.vmem %s1405_s22, 2048  ;;  %p1407_p9 = scmp.lt.s32.totalorder %s1658_s12, %s1405_s22 }
  0x28   : > { %p1402_p5 = pnand %p1400_p2, %p1386_p3  ;;  %p1408_p4 = scmp.lt.s32.totalorder %s1406_s24, %s1399_s9 }
  0x2a   : > { %p1403_p11 = pneg %p1402_p5  ;;  %p1409_p7 = por %p1408_p4, %p1407_p9 }
  0x2c   : > { %p1410_p10 = pnand %p1409_p7, %p1403_p11 }
  0x2e   : > { %1413 = shalt.err (!%p1410_p10)
}
  0x2f   : > { %s2375_s21 = smov 256   ;;  %s1534_s25 = smov 16  }
  0x30   : > { %1248 = dma.hbm_to_vmem [thread:$0]  (!%p1662_p0), %s1654_s10, 1024, %s1658_s12, %s196_s14, %s2375_s21, %s2375_s21, %s1534_s25  }
  0x31   : > { %p241_p9 = scmp.lt.s32.totalorder %s1530_s20, 3  ;;  %s1704_s9 = scalar_lea.hbm %s2372_s3, %s1236_s7 }
  0x32   : > { %p2389_p11 = scmp.ge.s32.totalorder %s1530_s20, 1  ;;  %s223_s22 = scalar_lea.vmem [#allocation5], %s1206_s6 }
  0x33   : > { %s233_s24 = sshll.u32 %s223_s22, 4  ;;  %s220_s10 = scalar_lea.sflag [#allocation6], %s1645_s5  ;;  %s1714_s24 = int_to_ptr.vmem [resolvable:$true] %s233_s24 }
  0x34   : > { %p1708_p12 = pnand %p2389_p11, %p241_p9  ;;  %s1414_s12 = scalar_lea.hbm %s1704_s9, 1024 }
  0x35   : > { %p1415_p1 = scmp.ne.s32.totalorder %s1704_s9, %s1414_s12  ;;  %s1419_s26 = scalar_lea.hbm %s2372_s3, 2048 }
  0x36   : > { %p1420_p2 = scmp.lt.u32.totalorder %s1704_s9, %s2372_s3  ;;  %p1421_p5 = scmp.lt.u32.totalorder %s1419_s26, %s1414_s12 }
  0x37   : > { %p1417_p6 = pnand %p1415_p1, %p1386_p3  ;;  %p1423_p7 = scmp.lt.u32.totalorder %s1414_s12, %s1704_s9 }
  0x38   : > { %p1422_p4 = por %p1421_p5, %p1420_p2 }
  0x39   : > { %p1418_p13 = pneg %p1417_p6 }
  0x3a   : > { %p1424_p10 = por %p1423_p7, %p1422_p4 }
  0x3c   : > { %p1425_p9 = pnand %p1424_p10, %p1418_p13 }
  0x3e   : > { %1428 = shalt.err (!%p1425_p9)
}
  0x3f   : > { %s1429_s6 = scalar_lea.vmem %s1714_s24, 1024  ;;  %s1535_s22 = smov [#allocation5]  }
  0x40   : > { %p1430_p11 = scmp.ne.s32.totalorder %s1714_s24, %s1429_s6  ;;  %s1434_s7 = sshll.u32 %s1535_s22, 4  ;;  %s1435_s7 = int_to_ptr.vmem [resolvable:$false] %s1434_s7 }
  0x41   : > { %s1436_s21 = scalar_lea.vmem %s1435_s7, 2048  ;;  %p1437_p8 = scmp.lt.s32.totalorder %s1714_s24, %s1435_s7 }
  0x42   : > { %p1432_p1 = pnand %p1430_p11, %p1386_p3  ;;  %p1438_p2 = scmp.lt.s32.totalorder %s1436_s21, %s1429_s6 }
  0x44   : > { %p1433_p6 = pneg %p1432_p1  ;;  %p1439_p5 = por %p1438_p2, %p1437_p8 }
  0x46   : > { %p1440_p4 = pnand %p1439_p5, %p1433_p6 }
  0x48   : > { %1443 = shalt.err (!%p1440_p4)
}
  0x49   : > { %s2391_s12 = smov 256   ;;  %245 = sbr.rel (%p1708_p12) target bundleno = 486 (0x1e6), region = 36 }
  0x4a   : > { %1251 = dma.hbm_to_vmem [thread:$0]  (!%p1662_p0), %s1704_s9, 1024, %s1714_s24, %s220_s10, %s2391_s12, %s2391_s12, %s1534_s25  }
  0x50   : > { %s1748_s14 = sand.u32 1, %s1514_s16   ;;  %p2392_p8 = scmp.ne.s32.totalorder %s2385_s27, 0 }
  0x51   : > { %s1751_s26 = sshll.u32 %s1748_s14, 6  ;;  %s248_s13 = scalar_lea.sflag [#allocation3], %s1748_s14 }
  0x52   : > { %s1755_s8 = scalar_lea.vmem [#allocation2], %s1751_s26 }
  0x53   : > { %1497 = dma.done.wait (%p2392_p8), %s248_s13, 1024  }
  0x54   : > { %1499 = vsyncadd (%p2392_p8), %s248_s13, 4294966272  ;;  %s257_s5 = scalar_lea.sflag [#allocation6], %s1748_s14  ;;  %s1763_s25 = scalar_lea.vmem [#allocation5], %s1751_s26 }
  0x55   : > { %1501 = dma.done.wait (%p2392_p8), %s257_s5, 1024  }
  0x56   : > { %1503 = vsyncadd (%p2392_p8), %s257_s5, 4294966272  ;;  %v1770_v0 = vld [vmem:[%s1763_s25 + $0x20] sm:$0xff]  ;;  %v1536_v2 = vmov 0   ;;  %s1537_s9 = smov 17   ;;  %v1778_v3 = vld [vmem:[%s1763_s25 + $0x30] sm:$0xff]  ;;  %s1538_s27 = smov 16   ;;  %v2377_v11 = vlaneseq }
  0x57   : > { %2393 = vst [vmem:[#allocation11_spill] sm:$0xff] %v1770_v0  ;;  %v1773_v1 = vld [vmem:[%s1763_s25] sm:$0xff]  ;;  %1327 = vset.pattern.permute.xlu1 %v1536_v2  ;;  %1326 = vset.pattern.permute.xlu0 %v1536_v2  ;;  %2394 = vst [vmem:[#allocation12_spill] sm:$0xff] %v1778_v3  ;;  %v1781_v4 = vld [vmem:[%s1763_s25 + $0x10] sm:$0xff]  ;;  %s1539_s11 = smov 15   ;;  %s1540_s24 = smov 1  }
  0x58   : > { %315 = vrot.lane.b32.xlu1 %v1770_v0, %s1537_s9  ;;  %311 = vrot.lane.b32.xlu0 %v1773_v1, %s1537_s9  ;;  %v1786_v5 = vld [vmem:[%s1763_s25 + $0x18] sm:$0xff]  ;;  %v1789_v6 = vld [vmem:[%s1763_s25 + $0x8] sm:$0xff]  ;;  %s1541_s10 = smov 127   ;;  %s1542_s6 = smov 113   ;;  %v1868_v14 = vand.u32 127, %v2377_v11  ;;  %v1545_v29 = vmov 1  }
  0x59   : > { %v1794_v7 = vld [vmem:[%s1763_s25 + $0x38] sm:$0xff]  ;;  %v1797_v8 = vld [vmem:[%s1763_s25 + $0x28] sm:$0xff]  ;;  %s1543_s22 = smov 112   ;;  %s1544_s7 = smov 111   ;;  %v1893_v20 = vld [vmem:[%s2370_s1] sm:$0xff]  ;;  %v1546_v34 = vmov 2  }
  0x5a   : > { %2395 = vst [vmem:[#allocation13_spill] sm:$0xff] %v1794_v7  ;;  %2396 = vst [vmem:[#allocation14_spill] sm:$0xff] %v1797_v8  ;;  %vm329_vm0 = vcmp.lt.s32.totalorder %v1868_v14, 17  ;;  %v1888_v19 = vld [vmem:[%s2370_s1 + $0x8] sm:$0xff]  ;;  %v1904_v23 = vld [vmem:[%s2370_s1 + $0x10] sm:$0xff]  ;;  %vm374_vm1 = vcmp.lt.s32.totalorder %v1868_v14, 16 }
  0x5b   : > { %v1909_v24 = vld [vmem:[%s2370_s1 + $0x18] sm:$0xff]  ;;  %v1547_v44 = vmov 3   ;;  %vm420_vm2 = vcmp.lt.s32.totalorder %v1868_v14, 15  ;;  %v1548_v50 = vmov 4   ;;  %v1549_v61 = vmov 5   ;;  %s2292_s13 = scalar_lea.vmem [#allocation7], %s1751_s26 }
  0x5c   : > { %317 = vrot.lane.b32.xlu1 %v1778_v3, %s1537_s9  ;;  %313 = vrot.lane.b32.xlu0 %v1781_v4, %s1537_s9  ;;  %vm466_vm3 = vcmp.lt.s32.totalorder %v1868_v14, 1  ;;  %v1550_v2 = vmov 6   ;;  %vm512_vm4 = vcmp.lt.s32.totalorder %v1868_v14, 127  ;;  %vm558_vm5 = vcmp.lt.s32.totalorder %v1868_v14, 113  ;;  %s1238_s26 = sshll.u32 %s1522_s18, 10  ;;  %s1057_s18 = scalar_lea.sflag [#allocation4], %s1748_s14 }
  0x5d   : > { %vm604_vm6 = vcmp.lt.s32.totalorder %v1868_v14, 112  ;;  %vm650_vm7 = vcmp.lt.s32.totalorder %v1868_v14, 111  ;;  %p2460_p3 = scmp.ne.s32.totalorder %s2386_s28, 0 }
  0x60   : > { %321 = vrot.lane.b32.xlu1 %v1786_v5, %s1537_s9  ;;  %319 = vrot.lane.b32.xlu0 %v1789_v6, %s1537_s9 }
  0x64   : > { %325 = vrot.lane.b32.xlu1 %v1794_v7, %s1537_s9  ;;  %323 = vrot.lane.b32.xlu0 %v1797_v8, %s1537_s9 }
  0x68   : > { %360 = vrot.lane.b32.xlu1 %v1781_v4, %s1538_s27  ;;  %358 = vrot.lane.b32.xlu0 %v1773_v1, %s1538_s27 }
  0x6c   : > { %364 = vrot.lane.b32.xlu1 %v1778_v3, %s1538_s27  ;;  %362 = vrot.lane.b32.xlu0 %v1770_v0, %s1538_s27 }
  0x70   : > { %368 = vrot.lane.b32.xlu1 %v1786_v5, %s1538_s27  ;;  %366 = vrot.lane.b32.xlu0 %v1789_v6, %s1538_s27 }
  0x74   : > { %372 = vrot.lane.b32.xlu1 %v1794_v7, %s1538_s27  ;;  %370 = vrot.lane.b32.xlu0 %v1797_v8, %s1538_s27 }
  0x78   : > { %406 = vrot.lane.b32.xlu1 %v1781_v4, %s1539_s11  ;;  %404 = vrot.lane.b32.xlu0 %v1773_v1, %s1539_s11 }
  0x7c   : > { %410 = vrot.lane.b32.xlu1 %v1778_v3, %s1539_s11  ;;  %408 = vrot.lane.b32.xlu0 %v1770_v0, %s1539_s11 }
  0x80   : > { %414 = vrot.lane.b32.xlu1 %v1786_v5, %s1539_s11  ;;  %412 = vrot.lane.b32.xlu0 %v1789_v6, %s1539_s11 }
  0x84   : > { %418 = vrot.lane.b32.xlu1 %v1794_v7, %s1539_s11  ;;  %416 = vrot.lane.b32.xlu0 %v1797_v8, %s1539_s11 }
  0x88   : > { %452 = vrot.lane.b32.xlu1 %v1781_v4, %s1540_s24  ;;  %450 = vrot.lane.b32.xlu0 %v1773_v1, %s1540_s24 }
  0x8c   : > { %456 = vrot.lane.b32.xlu1 %v1778_v3, %s1540_s24  ;;  %454 = vrot.lane.b32.xlu0 %v1770_v0, %s1540_s24 }
  0x90   : > { %460 = vrot.lane.b32.xlu1 %v1786_v5, %s1540_s24  ;;  %458 = vrot.lane.b32.xlu0 %v1789_v6, %s1540_s24 }
  0x94   : > { %464 = vrot.lane.b32.xlu1 %v1794_v7, %s1540_s24  ;;  %462 = vrot.lane.b32.xlu0 %v1797_v8, %s1540_s24  ;;  %s1553_s24 = smov [#allocation7]  }
  0x98   : > { %498 = vrot.lane.b32.xlu1 %v1781_v4, %s1541_s10  ;;  %496 = vrot.lane.b32.xlu0 %v1773_v1, %s1541_s10 }
  0x9c   : > { %502 = vrot.lane.b32.xlu1 %v1778_v3, %s1541_s10  ;;  %500 = vrot.lane.b32.xlu0 %v1770_v0, %s1541_s10 }
  0xa0   : > { %506 = vrot.lane.b32.xlu1 %v1786_v5, %s1541_s10  ;;  %504 = vrot.lane.b32.xlu0 %v1789_v6, %s1541_s10 }
  0xa4   : > { %510 = vrot.lane.b32.xlu1 %v1794_v7, %s1541_s10  ;;  %508 = vrot.lane.b32.xlu0 %v1797_v8, %s1541_s10  ;;  %s1448_s10 = sshll.u32 %s1553_s24, 4  ;;  %s1449_s10 = int_to_ptr.vmem [resolvable:$false] %s1448_s10 }
  0xa8   : > { %544 = vrot.lane.b32.xlu1 %v1781_v4, %s1542_s6  ;;  %542 = vrot.lane.b32.xlu0 %v1773_v1, %s1542_s6 }
  0xac   : > { %548 = vrot.lane.b32.xlu1 %v1778_v3, %s1542_s6  ;;  %546 = vrot.lane.b32.xlu0 %v1770_v0, %s1542_s6 }
  0xb0   : > { %552 = vrot.lane.b32.xlu1 %v1786_v5, %s1542_s6  ;;  %550 = vrot.lane.b32.xlu0 %v1789_v6, %s1542_s6 }
  0xb4   : > { %556 = vrot.lane.b32.xlu1 %v1794_v7, %s1542_s6  ;;  %554 = vrot.lane.b32.xlu0 %v1797_v8, %s1542_s6  ;;  %s1450_s6 = scalar_lea.vmem %s1449_s10, 2048 }
  0xb8   : > { %590 = vrot.lane.b32.xlu1 %v1781_v4, %s1543_s22  ;;  %588 = vrot.lane.b32.xlu0 %v1773_v1, %s1543_s22 }
  0xbc   : > { %594 = vrot.lane.b32.xlu1 %v1778_v3, %s1543_s22  ;;  %592 = vrot.lane.b32.xlu0 %v1770_v0, %s1543_s22 }
  0xc0   : > { %598 = vrot.lane.b32.xlu1 %v1786_v5, %s1543_s22  ;;  %596 = vrot.lane.b32.xlu0 %v1789_v6, %s1543_s22 }
  0xc4   : > { %602 = vrot.lane.b32.xlu1 %v1794_v7, %s1543_s22  ;;  %600 = vrot.lane.b32.xlu0 %v1797_v8, %s1543_s22 }
  0xc8   : > { %636 = vrot.lane.b32.xlu1 %v1781_v4, %s1544_s7  ;;  %634 = vrot.lane.b32.xlu0 %v1773_v1, %s1544_s7 }
  0xca   : > { %v1859_v9 = vpop.permute.xlu1 %315  ;;  %v312_v10 = vpop.permute.xlu0 %311 }
  0xcc   : > { %640 = vrot.lane.b32.xlu1 %v1778_v3, %s1544_s7  ;;  %638 = vrot.lane.b32.xlu0 %v1770_v0, %s1544_s7 }
  0xce   : > { %v1863_v12 = vpop.permute.xlu1 %317  ;;  %v1865_v13 = vpop.permute.xlu0 %313 }
  0xd0   : > { %644 = vrot.lane.b32.xlu1 %v1786_v5, %s1544_s7  ;;  %642 = vrot.lane.b32.xlu0 %v1789_v6, %s1544_s7 }
  0xd2   : > { %v1873_v15 = vpop.permute.xlu1 %321  ;;  %v320_v16 = vpop.permute.xlu0 %319 }
  0xd3   : > { %v1877_v17 = vsel %vm329_vm0, %v312_v10, %v320_v16  ;;  %v1881_v18 = vsel %vm329_vm0, %v320_v16, %v312_v10 }
  0xd4   : > { %648 = vrot.lane.b32.xlu1 %v1794_v7, %s1544_s7  ;;  %646 = vrot.lane.b32.xlu0 %v1797_v8, %s1544_s7 }
  0xd6   : > { %v1895_v21 = vpop.permute.xlu1 %325  ;;  %v1897_v22 = vpop.permute.xlu0 %323 }
  0xd8   : > { %691 = vperm.xlu1 %1327, %v1888_v19   ;;  %686 = vperm.xlu0 %1326, %v1893_v20  }
  0xda   : > { %v1911_v25 = vpop.permute.xlu1 %360  ;;  %v359_v26 = vpop.permute.xlu0 %358 }
  0xdc   : > { %696 = vperm.xlu1 %1327, %v1904_v23   ;;  %701 = vperm.xlu0 %1326, %v1909_v24  }
  0xde   : > { %v365_v27 = vpop.permute.xlu1 %364  ;;  %v363_v28 = vpop.permute.xlu0 %362 }
  0xe0   : > { %1328 = vset.pattern.permute.xlu1 %v1545_v29  ;;  %1329 = vset.pattern.permute.xlu0 %v1545_v29 }
  0xe1   : > { %713 = vperm.xlu1 %1328, %v1893_v20   ;;  %717 = vperm.xlu0 %1329, %v1888_v19  }
  0xe2   : > { %v1918_v30 = vpop.permute.xlu1 %368  ;;  %v367_v31 = vpop.permute.xlu0 %366 }
  0xe3   : > { %v1922_v32 = vsel %vm374_vm1, %v359_v26, %v367_v31  ;;  %v1926_v33 = vsel %vm374_vm1, %v367_v31, %v359_v26 }
  0xe5   : > { %721 = vperm.xlu1 %1328, %v1904_v23   ;;  %1330 = vset.pattern.permute.xlu0 %v1546_v34 }
  0xe6   : > { %v373_v35 = vpop.permute.xlu1 %372  ;;  %745 = vperm.xlu0 %1330, %v1893_v20   ;;  %v371_v36 = vpop.permute.xlu0 %370 }
  0xe7   : > { %v1932_v37 = vsel %vm374_vm1, %v365_v27, %v373_v35  ;;  %v1936_v38 = vsel %vm374_vm1, %v373_v35, %v365_v27  ;;  %v1940_v39 = vsel %vm374_vm1, %v363_v28, %v371_v36  ;;  %v1944_v40 = vsel %vm374_vm1, %v371_v36, %v363_v28 }
  0xe9   : > { %725 = vperm.xlu1 %1328, %v1909_v24  }
  0xea   : > { %v407_v41 = vpop.permute.xlu1 %406  ;;  %757 = vperm.xlu0 %1330, %v1909_v24   ;;  %v405_v42 = vpop.permute.xlu0 %404 }
  0xed   : > { %1331 = vset.pattern.permute.xlu1 %v1546_v34 }
  0xee   : > { %749 = vperm.xlu1 %1331, %v1888_v19   ;;  %v411_v43 = vpop.permute.xlu1 %410  ;;  %1333 = vset.pattern.permute.xlu0 %v1547_v44  ;;  %v409_v45 = vpop.permute.xlu0 %408 }
  0xef   : > { %781 = vperm.xlu0 %1333, %v1888_v19  }
  0xf2   : > { %753 = vperm.xlu1 %1331, %v1904_v23   ;;  %v415_v46 = vpop.permute.xlu1 %414  ;;  %v413_v47 = vpop.permute.xlu0 %412 }
  0xf3   : > { %v1954_v48 = vsel %vm420_vm2, %v407_v41, %v415_v46  ;;  %v1958_v49 = vsel %vm420_vm2, %v415_v46, %v407_v41  ;;  %1334 = vset.pattern.permute.xlu0 %v1548_v50  ;;  %v1962_v51 = vsel %vm420_vm2, %v405_v42, %v413_v47  ;;  %v1966_v52 = vsel %vm420_vm2, %v413_v47, %v405_v42 }
  0xf4   : > { %809 = vperm.xlu0 %1334, %v1893_v20  }
  0xf6   : > { %1332 = vset.pattern.permute.xlu1 %v1547_v44  ;;  %v419_v53 = vpop.permute.xlu1 %418  ;;  %v417_v54 = vpop.permute.xlu0 %416  ;;  %v1551_v44 = vmov 7  }
  0xf7   : > { %v1971_v55 = vsel %vm420_vm2, %v411_v43, %v419_v53  ;;  %v1975_v56 = vsel %vm420_vm2, %v419_v53, %v411_v43  ;;  %777 = vperm.xlu1 %1332, %v1893_v20   ;;  %v1980_v57 = vsel %vm420_vm2, %v409_v45, %v417_v54  ;;  %v1984_v58 = vsel %vm420_vm2, %v417_v54, %v409_v45 }
  0xf8   : > { %821 = vperm.xlu0 %1334, %v1909_v24  }
  0xfa   : > { %v453_v59 = vpop.permute.xlu1 %452  ;;  %v451_v60 = vpop.permute.xlu0 %450 }
  0xfb   : > { %785 = vperm.xlu1 %1332, %v1904_v23  }
  0xfc   : > { %1337 = vset.pattern.permute.xlu0 %v1549_v61 }
  0xfd   : > { %845 = vperm.xlu0 %1337, %v1888_v19  }
  0xfe   : > { %v457_v62 = vpop.permute.xlu1 %456  ;;  %v455_v63 = vpop.permute.xlu0 %454 }
  0xff   : > { %789 = vperm.xlu1 %1332, %v1909_v24  }
 0x101   : > { %1338 = vset.pattern.permute.xlu0 %v1550_v2 }
 0x102   : > { %v461_v10 = vpop.permute.xlu1 %460  ;;  %873 = vperm.xlu0 %1338, %v1893_v20   ;;  %v459_v16 = vpop.permute.xlu0 %458 }
 0x103   : > { %v1994_v26 = vsel %vm466_vm3, %v453_v59, %v461_v10  ;;  %v1998_v27 = vsel %vm466_vm3, %v461_v10, %v453_v59  ;;  %1335 = vset.pattern.permute.xlu1 %v1548_v50  ;;  %v2002_v28 = vsel %vm466_vm3, %v451_v60, %v459_v16  ;;  %v2006_v29 = vsel %vm466_vm3, %v459_v16, %v451_v60 }
 0x104   : > { %813 = vperm.xlu1 %1335, %v1888_v19   ;;  %v1552_v50 = vmov 8  }
 0x106   : > { %v465_v31 = vpop.permute.xlu1 %464  ;;  %885 = vperm.xlu0 %1338, %v1909_v24   ;;  %v463_v34 = vpop.permute.xlu0 %462 }
 0x107   : > { %v2012_v35 = vsel %vm466_vm3, %v457_v62, %v465_v31  ;;  %v2016_v36 = vsel %vm466_vm3, %v465_v31, %v457_v62  ;;  %v2020_v41 = vsel %vm466_vm3, %v455_v63, %v463_v34  ;;  %v2024_v42 = vsel %vm466_vm3, %v463_v34, %v455_v63 }
 0x108   : > { %817 = vperm.xlu1 %1335, %v1904_v23  }
 0x10a   : > { %v499_v43 = vpop.permute.xlu1 %498  ;;  %1341 = vset.pattern.permute.xlu0 %v1551_v44  ;;  %v497_v45 = vpop.permute.xlu0 %496 }
 0x10b   : > { %909 = vperm.xlu0 %1341, %v1888_v19  }
 0x10c   : > { %1336 = vset.pattern.permute.xlu1 %v1549_v61 }
 0x10d   : > { %841 = vperm.xlu1 %1336, %v1893_v20  }
 0x10e   : > { %v503_v46 = vpop.permute.xlu1 %502  ;;  %v501_v47 = vpop.permute.xlu0 %500 }
 0x10f   : > { %1342 = vset.pattern.permute.xlu0 %v1552_v50 }
 0x110   : > { %937 = vperm.xlu0 %1342, %v1893_v20  }
 0x111   : > { %849 = vperm.xlu1 %1336, %v1904_v23  }
 0x112   : > { %v507_v53 = vpop.permute.xlu1 %506  ;;  %v505_v54 = vpop.permute.xlu0 %504 }
 0x113   : > { %v2032_v59 = vsel %vm512_vm4, %v499_v43, %v507_v53  ;;  %v2034_v60 = vsel %vm512_vm4, %v507_v53, %v499_v43  ;;  %v2036_v62 = vsel %vm512_vm4, %v497_v45, %v505_v54  ;;  %v2038_v61 = vsel %vm512_vm4, %v505_v54, %v497_v45 }
 0x114   : > { %2397 = vst [vmem:[#allocation15_spill] sm:$0xff] %v2038_v61  ;;  %949 = vperm.xlu0 %1342, %v1909_v24  }
 0x115   : > { %853 = vperm.xlu1 %1336, %v1909_v24  }
 0x116   : > { %v511_v63 = vpop.permute.xlu1 %510  ;;  %v509_v10 = vpop.permute.xlu0 %508 }
 0x117   : > { %v2042_v16 = vsel %vm512_vm4, %v503_v46, %v511_v63  ;;  %v2044_v31 = vsel %vm512_vm4, %v511_v63, %v503_v46  ;;  %v2046_v34 = vsel %vm512_vm4, %v501_v47, %v509_v10  ;;  %v2048_v11 = vsel %vm512_vm4, %v509_v10, %v501_v47 }
 0x118   : > { %2398 = vst [vmem:[#allocation16_spill] sm:$0xff] %v2042_v16  ;;  %2399 = vst [vmem:[#allocation17_spill] sm:$0xff] %v2044_v31 }
 0x119   : > { %2400 = vst [vmem:[#allocation18_spill] sm:$0xff] %v2046_v34  ;;  %2401 = vst [vmem:[#allocation19_spill] sm:$0xff] %v2048_v11  ;;  %1339 = vset.pattern.permute.xlu1 %v1550_v2 }
 0x11a   : > { %877 = vperm.xlu1 %1339, %v1888_v19   ;;  %v545_v43 = vpop.permute.xlu1 %544  ;;  %v543_v45 = vpop.permute.xlu0 %542 }
 0x11e   : > { %881 = vperm.xlu1 %1339, %v1904_v23   ;;  %v549_v53 = vpop.permute.xlu1 %548  ;;  %v547_v54 = vpop.permute.xlu0 %546 }
 0x122   : > { %1340 = vset.pattern.permute.xlu1 %v1551_v44  ;;  %v553_v7 = vpop.permute.xlu1 %552  ;;  %v551_v16 = vpop.permute.xlu0 %550 }
 0x123   : > { %v2053_v46 = vsel %vm558_vm5, %v545_v43, %v553_v7  ;;  %v2055_v63 = vsel %vm558_vm5, %v553_v7, %v545_v43  ;;  %905 = vperm.xlu1 %1340, %v1893_v20   ;;  %v2058_v2 = vsel %vm558_vm5, %v543_v45, %v551_v16  ;;  %v2060_v47 = vsel %vm558_vm5, %v551_v16, %v543_v45 }
 0x124   : > { %2402 = vst [vmem:[#allocation20_spill] sm:$0xff] %v2053_v46  ;;  %2403 = vst [vmem:[#allocation21_spill] sm:$0xff] %v2055_v63 }
 0x125   : > { %2404 = vst [vmem:[#allocation22_spill] sm:$0xff] %v2058_v2  ;;  %2405 = vst [vmem:[#allocation23_spill] sm:$0xff] %v2060_v47 }
 0x126   : > { %v557_v10 = vpop.permute.xlu1 %556  ;;  %v555_v31 = vpop.permute.xlu0 %554 }
 0x127   : > { %v2062_v3 = vsel %vm558_vm5, %v549_v53, %v557_v10  ;;  %v2064_v11 = vsel %vm558_vm5, %v557_v10, %v549_v53  ;;  %913 = vperm.xlu1 %1340, %v1904_v23   ;;  %v2067_v44 = vsel %vm558_vm5, %v547_v54, %v555_v31  ;;  %v2069_v34 = vsel %vm558_vm5, %v555_v31, %v547_v54 }
 0x128   : > { %2406 = vst [vmem:[#allocation24_spill] sm:$0xff] %v2062_v3  ;;  %2407 = vst [vmem:[#allocation25_spill] sm:$0xff] %v2064_v11 }
 0x129   : > { %2408 = vst [vmem:[#allocation26_spill] sm:$0xff] %v2067_v44  ;;  %2409 = vst [vmem:[#allocation27_spill] sm:$0xff] %v2069_v34 }
 0x12a   : > { %v591_v7 = vpop.permute.xlu1 %590  ;;  %v589_v43 = vpop.permute.xlu0 %588 }
 0x12b   : > { %917 = vperm.xlu1 %1340, %v1909_v24  }
 0x12e   : > { %v595_v20 = vpop.permute.xlu1 %594  ;;  %v593_v63 = vpop.permute.xlu0 %592 }
 0x12f   : > { %1343 = vset.pattern.permute.xlu1 %v1552_v50 }
 0x130   : > { %941 = vperm.xlu1 %1343, %v1888_v19  }
 0x132   : > { %v599_v16 = vpop.permute.xlu1 %598  ;;  %v597_v45 = vpop.permute.xlu0 %596 }
 0x133   : > { %v2074_v53 = vsel %vm604_vm6, %v591_v7, %v599_v16  ;;  %v2076_v10 = vsel %vm604_vm6, %v599_v16, %v591_v7  ;;  %v2078_v44 = vsel %vm604_vm6, %v589_v43, %v597_v45  ;;  %v2080_v31 = vsel %vm604_vm6, %v597_v45, %v589_v43 }
 0x134   : > { %2410 = vst [vmem:[#allocation28_spill] sm:$0xff] %v2074_v53  ;;  %2411 = vst [vmem:[#allocation29_spill] sm:$0xff] %v2076_v10  ;;  %945 = vperm.xlu1 %1343, %v1904_v23  }
 0x135   : > { %2412 = vst [vmem:[#allocation30_spill] sm:$0xff] %v2078_v44  ;;  %2413 = vst [vmem:[#allocation31_spill] sm:$0xff] %v2080_v31 }
 0x136   : > { %v603_v24 = vpop.permute.xlu1 %602  ;;  %v601_v54 = vpop.permute.xlu0 %600 }
 0x137   : > { %v2083_v34 = vsel %vm604_vm6, %v595_v20, %v603_v24  ;;  %v2085_v50 = vsel %vm604_vm6, %v603_v24, %v595_v20  ;;  %v2087_v19 = vsel %vm604_vm6, %v593_v63, %v601_v54  ;;  %v2089_v46 = vsel %vm604_vm6, %v601_v54, %v593_v63 }
 0x138   : > { %2414 = vst [vmem:[#allocation32_spill] sm:$0xff] %v2083_v34  ;;  %2415 = vst [vmem:[#allocation33_spill] sm:$0xff] %v2085_v50 }
 0x139   : > { %2416 = vst [vmem:[#allocation34_spill] sm:$0xff] %v2087_v19  ;;  %2417 = vst [vmem:[#allocation35_spill] sm:$0xff] %v2089_v46  ;;  %v1216_v19 = vld [vmem:[%s2369_s0 + $0x1] ss:$8 sm:$0x3] }
 0x13a   : > { %v637_v11 = vpop.permute.xlu1 %636  ;;  %v2091_v53 = vpop.permute.xlu0 %634 }
 0x13b   : > { %2418 = vst [vmem:[#allocation36_spill] sm:$0xff] %v2091_v53 }
 0x13e   : > { %v641_v7 = vpop.permute.xlu1 %640  ;;  %v639_v16 = vpop.permute.xlu0 %638 }
 0x140   : > { %v2451_v14 = vld [vmem:[#allocation35_spill] sm:$0xff] }
 0x142   : > { %v645_v43 = vpop.permute.xlu1 %644  ;;  %v2094_v45 = vpop.permute.xlu0 %642 }
 0x143   : > { %2419 = vst [vmem:[#allocation37_spill] sm:$0xff] %v2094_v45  ;;  %v2098_v23 = vsel %vm650_vm7, %v637_v11, %v645_v43  ;;  %v2102_v20 = vsel %vm650_vm7, %v645_v43, %v637_v11  ;;  %v2426_v11 = vlaneseq }
 0x144   : > { %2420 = vst [vmem:[#allocation38_spill] sm:$0xff] %v2098_v23  ;;  %2421 = vst [vmem:[#allocation39_spill] sm:$0xff] %v2102_v20 }
 0x145   : > { %v341_v43 = vshrl.u32 %v2426_v11, 7 }
 0x146   : > { %v649_v63 = vpop.permute.xlu1 %648  ;;  %v647_v24 = vpop.permute.xlu0 %646 }
 0x147   : > { %v2106_v54 = vsel %vm650_vm7, %v641_v7, %v649_v63  ;;  %v2110_v50 = vsel %vm650_vm7, %v649_v63, %v641_v7  ;;  %v2114_v34 = vsel %vm650_vm7, %v639_v16, %v647_v24  ;;  %v2118_v23 = vsel %vm650_vm7, %v647_v24, %v639_v16 }
 0x148   : > { %2422 = vst [vmem:[#allocation40_spill] sm:$0xff] %v2106_v54  ;;  %2423 = vst [vmem:[#allocation41_spill] sm:$0xff] %v2110_v50  ;;  %v2121_v20 = vsub.s32 0, %v341_v43  ;;  %v2123_v46 = vsub.s32 1, %v341_v43  ;;  %v331_v16 = vsel %vm329_vm0, %v1865_v13, %v1873_v15  ;;  %v335_v24 = vsel %vm329_vm0, %v1873_v15, %v1865_v13 }
 0x149   : > { %2424 = vst [vmem:[#allocation42_spill] sm:$0xff] %v2114_v34  ;;  %2425 = vst [vmem:[#allocation43_spill] sm:$0xff] %v2118_v23  ;;  %v338_v54 = vld [vmem:[%s2369_s0] ss:$8 sm:$0x3]  ;;  %v332_v23 = vsel %vm329_vm0, %v1859_v9, %v1897_v22 }
 0x14a   : > { %v343_v7 = vrot.slane %v338_v54, %v2121_v20  ;;  %v347_v63 = vrot.slane %v338_v54, %v2123_v46  ;;  %v336_v54 = vsel %vm329_vm0, %v1897_v22, %v1859_v9  ;;  %v393_v44 = vrot.slane %v1216_v19, %v2123_v46 }
 0x14b   : > { %v376_v9 = vsel %vm374_vm1, %v1911_v25, %v1918_v30  ;;  %v380_v22 = vsel %vm374_vm1, %v1918_v30, %v1911_v25 }
 0x14c   : > { %v352_v11 = vmul.f32 %v343_v7, %v335_v24  ;;  %v353_v43 = vmul.f32 %v347_v63, %v331_v16  ;;  %v354_v15 = vmul.f32 %v343_v7, %v336_v54  ;;  %v355_v16 = vmul.f32 %v347_v63, %v332_v23  ;;  %v1217_v23 = vld [vmem:[%s2369_s0 + $0x2] ss:$8 sm:$0x3] }
 0x14d   : > { %v389_v24 = vrot.slane %v1216_v19, %v2121_v20  ;;  %v350_v19 = vmul.f32 %v343_v7, %v1881_v18  ;;  %v399_v10 = vmul.f32 %v393_v44, %v376_v9  ;;  %v397_v8 = vmul.f32 %v393_v44, %v1922_v32 }
 0x14e   : > { %v435_v0 = vrot.slane %v1217_v23, %v2121_v20  ;;  %v439_v25 = vrot.slane %v1217_v23, %v2123_v46  ;;  %v337_v32 = vsel %vm329_vm0, %v1895_v21, %v1863_v12 }
 0x14f   : > { %v398_v54 = vmul.f32 %v389_v24, %v380_v22  ;;  %v396_v3 = vmul.f32 %v389_v24, %v1926_v33  ;;  %v400_v33 = vmul.f32 %v389_v24, %v1944_v40 }
 0x150   : > { %v442_v23 = vmul.f32 %v435_v0, %v1966_v52  ;;  %v403_v52 = vmul.f32 %v393_v44, %v1932_v37  ;;  %v444_v37 = vmul.f32 %v435_v0, %v1958_v49  ;;  %v447_v49 = vmul.f32 %v439_v25, %v1980_v57 }
 0x157   : > { %v692_v34 = vpop.permute.xlu1 %691  ;;  %v687_v50 = vpop.permute.xlu0 %686 }
 0x158   : > { %v706_v31 = vmul.f32 %v692_v34, %v352_v11  ;;  %v707_v13 = vmul.f32 %v692_v34, %v353_v43  ;;  %v351_v43 = vmul.f32 %v347_v63, %v1877_v17  ;;  %v704_v30 = vmul.f32 %v687_v50, %v350_v19 }
 0x159   : > { %v333_v17 = vsel %vm329_vm0, %v1863_v12, %v1895_v21  ;;  %v443_v19 = vmul.f32 %v439_v25, %v1962_v51 }
 0x15b   : > { %v697_v53 = vpop.permute.xlu1 %696  ;;  %v702_v45 = vpop.permute.xlu0 %701 }
 0x15c   : > { %v708_v11 = vmul.f32 %v697_v53, %v354_v15  ;;  %v709_v34 = vmul.f32 %v697_v53, %v355_v16  ;;  %v705_v53 = vmul.f32 %v687_v50, %v351_v43  ;;  %v401_v50 = vmul.f32 %v393_v44, %v1940_v39 }
 0x15d   : > { %v445_v44 = vmul.f32 %v439_v25, %v1954_v48 }
 0x160   : > { %v714_v15 = vpop.permute.xlu1 %713  ;;  %v718_v16 = vpop.permute.xlu0 %717 }
 0x161   : > { %v728_v47 = vmul.f32 %v714_v15, %v396_v3  ;;  %v729_v2 = vmul.f32 %v714_v15, %v397_v8  ;;  %v730_v61 = vmul.f32 %v718_v16, %v398_v54  ;;  %v731_v18 = vmul.f32 %v718_v16, %v399_v10  ;;  %v1218_v3 = vld [vmem:[%s2369_s0 + $0x3] ss:$8 sm:$0x3] }
 0x162   : > { %v2184_v54 = vrot.slane %v1218_v3, %v2121_v20  ;;  %v2187_v12 = vrot.slane %v1218_v3, %v2123_v46  ;;  %v356_v15 = vmul.f32 %v343_v7, %v337_v32  ;;  %v357_v16 = vmul.f32 %v347_v63, %v333_v17 }
 0x163   : > { %v736_v8 = vadd.f32 %v728_v47, %v704_v30  ;;  %v737_v10 = vadd.f32 %v729_v2, %v705_v53  ;;  %v738_v9 = vadd.f32 %v730_v61, %v706_v31  ;;  %v739_v22 = vadd.f32 %v731_v18, %v707_v13 }
 0x164   : > { %v722_v43 = vpop.permute.xlu1 %721  ;;  %v402_v61 = vmul.f32 %v389_v24, %v1936_v38  ;;  %v448_v13 = vmul.f32 %v435_v0, %v1975_v56  ;;  %v449_v30 = vmul.f32 %v439_v25, %v1971_v55  ;;  %v490_v56 = vmul.f32 %v2184_v54, %v1998_v27 }
 0x165   : > { %v732_v21 = vmul.f32 %v722_v43, %v400_v33  ;;  %v733_v39 = vmul.f32 %v722_v43, %v401_v50  ;;  %v746_v40 = vpop.permute.xlu0 %745  ;;  %v710_v33 = vmul.f32 %v702_v45, %v356_v15  ;;  %v711_v50 = vmul.f32 %v702_v45, %v357_v16 }
 0x166   : > { %v760_v47 = vmul.f32 %v746_v40, %v442_v23  ;;  %v761_v2 = vmul.f32 %v746_v40, %v443_v19  ;;  %v491_v55 = vmul.f32 %v2187_v12, %v1994_v26  ;;  %v492_v57 = vmul.f32 %v2184_v54, %v2024_v42 }
 0x167   : > { %v740_v31 = vadd.f32 %v732_v21, %v708_v11  ;;  %v741_v51 = vadd.f32 %v733_v39, %v709_v34  ;;  %v446_v39 = vmul.f32 %v435_v0, %v1984_v58  ;;  %v493_v25 = vmul.f32 %v2187_v12, %v2020_v41 }
 0x168   : > { %v768_v53 = vadd.f32 %v760_v47, %v736_v8  ;;  %v769_v18 = vadd.f32 %v761_v2, %v737_v10  ;;  %v726_v3 = vpop.permute.xlu1 %725 }
 0x169   : > { %v734_v43 = vmul.f32 %v726_v3, %v402_v61  ;;  %v735_v7 = vmul.f32 %v726_v3, %v403_v52  ;;  %v758_v63 = vpop.permute.xlu0 %757  ;;  %v488_v52 = vmul.f32 %v2184_v54, %v2006_v29  ;;  %v494_v29 = vmul.f32 %v2184_v54, %v2016_v36 }
 0x16a   : > { %v766_v17 = vmul.f32 %v758_v63, %v448_v13  ;;  %v767_v32 = vmul.f32 %v758_v63, %v449_v30  ;;  %v489_v13 = vmul.f32 %v2187_v12, %v2002_v28  ;;  %v495_v28 = vmul.f32 %v2187_v12, %v2012_v35 }
 0x16b   : > { %v742_v23 = vadd.f32 %v734_v43, %v710_v33  ;;  %v743_v38 = vadd.f32 %v735_v7, %v711_v50  ;;  %v1219_v50 = vld [vmem:[%s2369_s0 + $0x5] ss:$8 sm:$0x3] }
 0x16d   : > { %v774_v24 = vadd.f32 %v766_v17, %v742_v23  ;;  %v775_v11 = vadd.f32 %v767_v32, %v743_v38  ;;  %v750_v45 = vpop.permute.xlu1 %749  ;;  %v531_v17 = vrot.slane %v1219_v50, %v2123_v46 }
 0x16e   : > { %v762_v34 = vmul.f32 %v750_v45, %v444_v37  ;;  %v763_v8 = vmul.f32 %v750_v45, %v445_v44  ;;  %v782_v10 = vpop.permute.xlu0 %781 }
 0x16f   : > { %v794_v19 = vmul.f32 %v782_v10, %v490_v56  ;;  %v795_v21 = vmul.f32 %v782_v10, %v491_v55  ;;  %v537_v12 = vmul.f32 %v531_v17, %v2034_v60 }
 0x170   : > { %v770_v40 = vadd.f32 %v762_v34, %v738_v9  ;;  %v771_v48 = vadd.f32 %v763_v8, %v739_v22  ;;  %v1220_v34 = vld [vmem:[%s2369_s0 + $0x6] ss:$8 sm:$0x3] }
 0x171   : > { %v754_v15 = vpop.permute.xlu1 %753 }
 0x172   : > { %v802_v16 = vadd.f32 %v794_v19, %v770_v40  ;;  %v803_v27 = vadd.f32 %v795_v21, %v771_v48  ;;  %v764_v47 = vmul.f32 %v754_v15, %v446_v39  ;;  %v765_v2 = vmul.f32 %v754_v15, %v447_v49  ;;  %v2427_v19 = vld [vmem:[#allocation15_spill] sm:$0xff]  ;;  %v2428_v39 = vld [vmem:[#allocation22_spill] sm:$0xff] }
 0x173   : > { %v810_v3 = vpop.permute.xlu0 %809  ;;  %v535_v21 = vmul.f32 %v531_v17, %v2427_v19  ;;  %v2429_v40 = vld [vmem:[#allocation23_spill] sm:$0xff] }
 0x174   : > { %v772_v26 = vadd.f32 %v764_v47, %v740_v31  ;;  %v773_v61 = vadd.f32 %v765_v2, %v741_v51  ;;  %v825_v60 = vmul.f32 %v810_v3, %v1789_v6  ;;  %v2431_v47 = vld [vmem:[#allocation14_spill] sm:$0xff] }
 0x176   : > { %v778_v30 = vpop.permute.xlu1 %777 }
 0x177   : > { %v792_v0 = vmul.f32 %v778_v30, %v488_v52  ;;  %v793_v58 = vmul.f32 %v778_v30, %v489_v13  ;;  %v822_v43 = vpop.permute.xlu0 %821  ;;  %v2432_v13 = vld [vmem:[#allocation18_spill] sm:$0xff] }
 0x179   : > { %v800_v9 = vadd.f32 %v792_v0, %v768_v53  ;;  %v801_v22 = vadd.f32 %v793_v58, %v769_v18  ;;  %v527_v18 = vrot.slane %v1219_v50, %v2121_v20 }
 0x17a   : > { %v786_v31 = vpop.permute.xlu1 %785 }
 0x17b   : > { %v796_v51 = vmul.f32 %v786_v31, %v492_v57  ;;  %v797_v33 = vmul.f32 %v786_v31, %v493_v25  ;;  %v536_v35 = vmul.f32 %v527_v18, %v2032_v59  ;;  %v824_v59 = vmul.f32 %v810_v3, %v1773_v1  ;;  %v2433_v3 = vld [vmem:[#allocation19_spill] sm:$0xff]  ;;  %v2434_v31 = vld [vmem:[#allocation12_spill] sm:$0xff] }
 0x17c   : > { %v846_v36 = vpop.permute.xlu0 %845  ;;  %v534_v10 = vmul.f32 %v527_v18, %v2036_v62  ;;  %v833_v6 = vadd.f32 %v825_v60, %v801_v22  ;;  %v538_v30 = vmul.f32 %v527_v18, %v2432_v13  ;;  %v539_v62 = vmul.f32 %v531_v17, %v2433_v3 }
 0x17d   : > { %v804_v42 = vadd.f32 %v796_v51, %v772_v26  ;;  %v805_v7 = vadd.f32 %v797_v33, %v773_v61  ;;  %v858_v44 = vmul.f32 %v846_v36, %v536_v35  ;;  %v859_v56 = vmul.f32 %v846_v36, %v537_v12  ;;  %v2435_v33 = vld [vmem:[#allocation13_spill] sm:$0xff]  ;;  %v2436_v36 = vld [vmem:[#allocation16_spill] sm:$0xff] }
 0x17e   : > { %v790_v63 = vpop.permute.xlu1 %789  ;;  %v832_v26 = vadd.f32 %v824_v59, %v800_v9  ;;  %v830_v51 = vmul.f32 %v822_v43, %v2434_v31  ;;  %v2437_v35 = vld [vmem:[#allocation17_spill] sm:$0xff] }
 0x17f   : > { %v798_v41 = vmul.f32 %v790_v63, %v494_v29  ;;  %v799_v53 = vmul.f32 %v790_v63, %v495_v28  ;;  %v831_v29 = vmul.f32 %v822_v43, %v2435_v33  ;;  %v541_v12 = vmul.f32 %v531_v17, %v2437_v35  ;;  %v1222_v31 = vld [vmem:[%s2369_s0 + $0x10] ss:$8 sm:$0x3] }
 0x180   : > { %v665_v35 = vrot.slane %v1222_v31, %v2121_v20 }
 0x181   : > { %v806_v32 = vadd.f32 %v798_v41, %v774_v24  ;;  %v807_v23 = vadd.f32 %v799_v53, %v775_v11  ;;  %v874_v15 = vpop.permute.xlu0 %873 }
 0x183   : > { %v814_v54 = vpop.permute.xlu1 %813 }
 0x184   : > { %v826_v38 = vmul.f32 %v814_v54, %v1781_v4  ;;  %v827_v37 = vmul.f32 %v814_v54, %v1786_v5  ;;  %v573_v4 = vrot.slane %v1220_v34, %v2121_v20  ;;  %v577_v5 = vrot.slane %v1220_v34, %v2123_v46 }
 0x185   : > { %v540_v54 = vmul.f32 %v527_v18, %v2436_v36  ;;  %v838_v34 = vadd.f32 %v830_v51, %v806_v32  ;;  %v2442_v32 = vld [vmem:[#allocation28_spill] sm:$0xff]  ;;  %v2449_v36 = vld [vmem:[#allocation31_spill] sm:$0xff] }
 0x186   : > { %v834_v55 = vadd.f32 %v826_v38, %v802_v16  ;;  %v835_v45 = vadd.f32 %v827_v37, %v803_v27  ;;  %v580_v49 = vmul.f32 %v573_v4, %v2428_v39  ;;  %v581_v48 = vmul.f32 %v577_v5, %v2429_v40  ;;  %v2430_v16 = vld [vmem:[#allocation11_spill] sm:$0xff]  ;;  %v886_v37 = vpop.permute.xlu0 %885 }
 0x187   : > { %v818_v24 = vpop.permute.xlu1 %817  ;;  %v1221_v38 = vld [vmem:[%s2369_s0 + $0x7] ss:$8 sm:$0x3] }
 0x188   : > { %v2225_v11 = vadd.f32 %v858_v44, %v834_v55  ;;  %v2227_v8 = vadd.f32 %v859_v56, %v835_v45  ;;  %v828_v27 = vmul.f32 %v818_v24, %v2430_v16  ;;  %v829_v2 = vmul.f32 %v818_v24, %v2431_v47  ;;  %v2438_v55 = vld [vmem:[#allocation24_spill] sm:$0xff] }
 0x189   : > { %v888_v0 = vmul.f32 %v874_v15, %v580_v49  ;;  %v889_v58 = vmul.f32 %v874_v15, %v581_v48  ;;  %v586_v43 = vmul.f32 %v573_v4, %v2438_v55  ;;  %v839_v24 = vadd.f32 %v831_v29, %v807_v23  ;;  %v2440_v49 = vld [vmem:[#allocation20_spill] sm:$0xff]  ;;  %v2441_v48 = vld [vmem:[#allocation21_spill] sm:$0xff] }
 0x18a   : > { %v836_v28 = vadd.f32 %v828_v27, %v804_v42  ;;  %v837_v50 = vadd.f32 %v829_v2, %v805_v7  ;;  %v2439_v42 = vld [vmem:[#allocation25_spill] sm:$0xff]  ;;  %v619_v18 = vrot.slane %v1221_v38, %v2121_v20  ;;  %v623_v17 = vrot.slane %v1221_v38, %v2123_v46  ;;  %v910_v16 = vpop.permute.xlu0 %909 }
 0x18b   : > { %v587_v7 = vmul.f32 %v577_v5, %v2439_v42  ;;  %v582_v40 = vmul.f32 %v573_v4, %v2440_v49  ;;  %v583_v15 = vmul.f32 %v577_v5, %v2441_v48 }
 0x18c   : > { %v842_v1 = vpop.permute.xlu1 %841  ;;  %v628_v23 = vmul.f32 %v619_v18, %v2442_v32 }
 0x18d   : > { %v856_v61 = vmul.f32 %v842_v1, %v534_v10  ;;  %v857_v52 = vmul.f32 %v842_v1, %v535_v21  ;;  %v894_v10 = vmul.f32 %v886_v37, %v586_v43  ;;  %v895_v19 = vmul.f32 %v886_v37, %v587_v7  ;;  %v2443_v1 = vld [vmem:[#allocation29_spill] sm:$0xff] }
 0x18f   : > { %v864_v57 = vadd.f32 %v856_v61, %v832_v26  ;;  %v865_v25 = vadd.f32 %v857_v52, %v833_v6  ;;  %v629_v26 = vmul.f32 %v623_v17, %v2443_v1  ;;  %v2444_v52 = vld [vmem:[#allocation26_spill] sm:$0xff]  ;;  %v938_v38 = vpop.permute.xlu0 %937 }
 0x190   : > { %v850_v63 = vpop.permute.xlu1 %849  ;;  %v584_v13 = vmul.f32 %v573_v4, %v2444_v52 }
 0x191   : > { %v860_v41 = vmul.f32 %v850_v63, %v538_v30  ;;  %v861_v9 = vmul.f32 %v850_v63, %v539_v62  ;;  %v896_v22 = vadd.f32 %v888_v0, %v864_v57  ;;  %v897_v53 = vadd.f32 %v889_v58, %v865_v25  ;;  %v2445_v30 = vld [vmem:[#allocation27_spill] sm:$0xff]  ;;  %v2447_v63 = vld [vmem:[#allocation36_spill] sm:$0xff] }
 0x192   : > { %v585_v3 = vmul.f32 %v577_v5, %v2445_v30  ;;  %v922_v62 = vmul.f32 %v910_v16, %v628_v23  ;;  %v923_v0 = vmul.f32 %v910_v16, %v629_v26  ;;  %v2454_v23 = vld [vmem:[#allocation40_spill] sm:$0xff] }
 0x193   : > { %v868_v44 = vadd.f32 %v860_v41, %v836_v28  ;;  %v869_v56 = vadd.f32 %v861_v9, %v837_v50  ;;  %v2446_v50 = vld [vmem:[#allocation37_spill] sm:$0xff]  ;;  %v2448_v41 = vld [vmem:[#allocation30_spill] sm:$0xff]  ;;  %v678_v1 = vmul.f32 %v665_v35, %v2454_v23  ;;  %v950_v26 = vpop.permute.xlu0 %949 }
 0x194   : > { %v854_v45 = vpop.permute.xlu1 %853  ;;  %v651_v4 = vsel %vm650_vm7, %v2447_v63, %v2446_v50  ;;  %v626_v9 = vmul.f32 %v619_v18, %v2448_v41  ;;  %v1023_v23 = vld [vmem:[%s1755_s8 + $0x38] sm:$0xff] }
 0x195   : > { %v862_v59 = vmul.f32 %v854_v45, %v540_v54  ;;  %v863_v60 = vmul.f32 %v854_v45, %v541_v12  ;;  %v627_v54 = vmul.f32 %v623_v17, %v2449_v36  ;;  %v669_v12 = vrot.slane %v1222_v31, %v2123_v46  ;;  %v2450_v45 = vld [vmem:[#allocation34_spill] sm:$0xff]  ;;  %v2452_v46 = vld [vmem:[#allocation32_spill] sm:$0xff] }
 0x196   : > { %v672_v55 = vmul.f32 %v665_v35, %v651_v4  ;;  %v632_v49 = vmul.f32 %v619_v18, %v2452_v46 }
 0x197   : > { %v870_v21 = vadd.f32 %v862_v59, %v838_v34  ;;  %v871_v39 = vadd.f32 %v863_v60, %v839_v24  ;;  %v630_v34 = vmul.f32 %v619_v18, %v2450_v45  ;;  %v631_v24 = vmul.f32 %v623_v17, %v2451_v14 }
 0x199   : > { %v878_v27 = vpop.permute.xlu1 %877  ;;  %v902_v47 = vadd.f32 %v894_v10, %v870_v21  ;;  %v903_v2 = vadd.f32 %v895_v19, %v871_v39 }
 0x19a   : > { %v890_v6 = vmul.f32 %v878_v27, %v582_v40  ;;  %v891_v61 = vmul.f32 %v878_v27, %v583_v15  ;;  %v2453_v40 = vld [vmem:[#allocation33_spill] sm:$0xff] }
 0x19b   : > { %v633_v48 = vmul.f32 %v623_v17, %v2453_v40 }
 0x19c   : > { %v898_v58 = vadd.f32 %v890_v6, %v2225_v11  ;;  %v899_v57 = vadd.f32 %v891_v61, %v2227_v8  ;;  %v655_v11 = vsel %vm650_vm7, %v2446_v50, %v2447_v63  ;;  %v2455_v61 = vld [vmem:[#allocation41_spill] sm:$0xff] }
 0x19d   : > { %v882_v25 = vpop.permute.xlu1 %881  ;;  %v673_v43 = vmul.f32 %v669_v12, %v655_v11 }
 0x19e   : > { %v892_v51 = vmul.f32 %v882_v25, %v584_v13  ;;  %v893_v33 = vmul.f32 %v882_v25, %v585_v3  ;;  %v930_v29 = vadd.f32 %v922_v62, %v898_v58  ;;  %v931_v28 = vadd.f32 %v923_v0, %v899_v57  ;;  %v2456_v62 = vld [vmem:[#allocation38_spill] sm:$0xff]  ;;  %v2457_v0 = vld [vmem:[#allocation39_spill] sm:$0xff] }
 0x19f   : > { %v958_v13 = vmul.f32 %v950_v26, %v678_v1  ;;  %v674_v17 = vmul.f32 %v665_v35, %v2456_v62  ;;  %v675_v58 = vmul.f32 %v669_v12, %v2457_v0 }
 0x1a0   : > { %v900_v8 = vadd.f32 %v892_v51, %v868_v44  ;;  %v901_v5 = vadd.f32 %v893_v33, %v869_v56  ;;  %v952_v44 = vmul.f32 %v938_v38, %v672_v55  ;;  %v953_v56 = vmul.f32 %v938_v38, %v673_v43 }
 0x1a2   : > { %v906_v37 = vpop.permute.xlu1 %905 }
 0x1a3   : > { %v920_v42 = vmul.f32 %v906_v37, %v626_v9  ;;  %v921_v7 = vmul.f32 %v906_v37, %v627_v54  ;;  %v2459_v9 = vld [vmem:[#allocation43_spill] sm:$0xff] }
 0x1a5   : > { %v928_v59 = vadd.f32 %v920_v42, %v896_v22  ;;  %v929_v60 = vadd.f32 %v921_v7, %v897_v53  ;;  %v679_v22 = vmul.f32 %v669_v12, %v2455_v61  ;;  %v1016_v7 = vld [vmem:[%s1755_s8] sm:$0xff]  ;;  %v1378_v61 = vld [vmem:[%s1763_s25 + $0x30] sm:$0xff] }
 0x1a6   : > { %v914_v10 = vpop.permute.xlu1 %913 }
 0x1a7   : > { %v960_v19 = vadd.f32 %v952_v44, %v928_v59  ;;  %v961_v21 = vadd.f32 %v953_v56, %v929_v60  ;;  %v924_v20 = vmul.f32 %v914_v10, %v630_v34  ;;  %v925_v39 = vmul.f32 %v914_v10, %v631_v24  ;;  %v1017_v34 = vld [vmem:[%s1755_s8 + $0x8] sm:$0xff]  ;;  %v1376_v44 = vld [vmem:[%s1763_s25] sm:$0xff] }
 0x1a8   : > { %v959_v30 = vmul.f32 %v950_v26, %v679_v22  ;;  %v1024_v56 = vsub.f32 %v1016_v7, %v1376_v44  ;;  %v1377_v10 = vld [vmem:[%s1763_s25 + $0x8] sm:$0xff] }
 0x1a9   : > { %v1223_v15 = vmul.f32 -1.442695, %v960_v19  ;;  %v1224_v16 = vmul.f32 -1.442695, %v961_v21  ;;  %v932_v27 = vadd.f32 %v924_v20, %v900_v8  ;;  %v933_v32 = vadd.f32 %v925_v39, %v901_v5  ;;  %v2458_v8 = vld [vmem:[#allocation42_spill] sm:$0xff] }
 0x1aa   : > { %v918_v6 = vpop.permute.xlu1 %917  ;;  %v676_v5 = vmul.f32 %v665_v35, %v2458_v8  ;;  %v1025_v19 = vsub.f32 %v1017_v34, %v1377_v10  ;;  %v1382_v8 = vld [vmem:[%s1763_s25 + $0x20] sm:$0xff] }
 0x1ab   : > { %1344 = vpow2.f32 %v1223_v15  ;;  %v926_v53 = vmul.f32 %v918_v6, %v632_v49  ;;  %v927_v52 = vmul.f32 %v918_v6, %v633_v48 }
 0x1ac   : > { %1346 = vpow2.f32 %v1224_v16  ;;  %v1022_v16 = vld [vmem:[%s1755_s8 + $0x30] sm:$0xff] }
 0x1ad   : > { %v934_v3 = vadd.f32 %v926_v53, %v902_v47  ;;  %v935_v18 = vadd.f32 %v927_v52, %v903_v2  ;;  %v677_v47 = vmul.f32 %v669_v12, %v2459_v9  ;;  %v1030_v22 = vsub.f32 %v1022_v16, %v1378_v61  ;;  %v1018_v53 = vld [vmem:[%s1755_s8 + $0x10] sm:$0xff]  ;;  %v1379_v52 = vld [vmem:[%s1763_s25 + $0x38] sm:$0xff]  ;;  %v1383_v9 = vld [vmem:[%s1763_s25 + $0x28] sm:$0xff] }
 0x1af   : > { %v966_v57 = vadd.f32 %v958_v13, %v934_v3  ;;  %v967_v25 = vadd.f32 %v959_v30, %v935_v18  ;;  %v942_v31 = vpop.permute.xlu1 %941  ;;  %v1031_v13 = vsub.f32 %v1023_v23, %v1379_v52  ;;  %v1019_v30 = vld [vmem:[%s1755_s8 + $0x18] sm:$0xff]  ;;  %v1380_v18 = vld [vmem:[%s1763_s25 + $0x10] sm:$0xff] }
 0x1b0   : > { %v954_v51 = vmul.f32 %v942_v31, %v674_v17  ;;  %v955_v33 = vmul.f32 %v942_v31, %v675_v58  ;;  %v1026_v62 = vsub.f32 %v1018_v53, %v1380_v18  ;;  %v1381_v58 = vld [vmem:[%s1763_s25 + $0x18] sm:$0xff]  ;;  %s2315_s25 = scalar_lea.hbm %s2373_s4, %s1238_s26 }
 0x1b1   : > { %v1229_v50 = vmul.f32 -1.442695, %v966_v57  ;;  %v1230_v63 = vmul.f32 -1.442695, %v967_v25  ;;  %v1027_v57 = vsub.f32 %v1019_v30, %v1381_v58  ;;  %v1020_v25 = vld [vmem:[%s1755_s8 + $0x20] sm:$0xff] }
 0x1b2   : > { %v962_v4 = vadd.f32 %v954_v51, %v930_v29  ;;  %v963_v11 = vadd.f32 %v955_v33, %v931_v28  ;;  %v1021_v51 = vld [vmem:[%s1755_s8 + $0x28] sm:$0xff]  ;;  %s1073_s8 = sshll.u32 %s2292_s13, 4  ;;  %s2317_s8 = int_to_ptr.vmem [resolvable:$true] %s1073_s8 }
 0x1b3   : > { %1348 = vpow2.f32 %v1229_v50  ;;  %v946_v41 = vpop.permute.xlu1 %945  ;;  %s1444_s11 = scalar_lea.vmem %s2317_s8, 1024  ;;  %p1451_p7 = scmp.lt.s32.totalorder %s2317_s8, %s1449_s10 }
 0x1b4   : > { %1350 = vpow2.f32 %v1230_v63  ;;  %v1225_v2 = vmul.f32 -1.442695, %v962_v4  ;;  %v1226_v36 = vmul.f32 -1.442695, %v963_v11  ;;  %v956_v54 = vmul.f32 %v946_v41, %v676_v5  ;;  %p1445_p0 = scmp.ne.s32.totalorder %s2317_s8, %s1444_s11  ;;  %p1452_p10 = scmp.lt.s32.totalorder %s1450_s6, %s1444_s11 }
 0x1b5   : > { %v1345_v38 = vpop.eup %1344  ;;  %v957_v37 = vmul.f32 %v946_v41, %v677_v47  ;;  %v1028_v5 = vsub.f32 %v1020_v25, %v1382_v8  ;;  %v1029_v47 = vsub.f32 %v1021_v51, %v1383_v9 }
 0x1b6   : > { %v1347_v55 = vpop.eup %1346  ;;  %v992_v43 = vadd.f32 1.0, %v1345_v38  ;;  %1352 = vpow2.f32 %v1225_v2  ;;  %v964_v29 = vadd.f32 %v956_v54, %v932_v27  ;;  %p1446_p12 = pnand %p1445_p0, %p2460_p3  ;;  %p1453_p9 = por %p1452_p10, %p1451_p7 }
 0x1b7   : > { %v993_v28 = vadd.f32 1.0, %v1347_v55  ;;  %1354 = vpow2.f32 %v1226_v36  ;;  %v965_v35 = vadd.f32 %v957_v37, %v933_v32 }
 0x1b8   : > { %1356 = vrcp.f32 %v992_v43  ;;  %v1227_v42 = vmul.f32 -1.442695, %v964_v29  ;;  %p1447_p13 = pneg %p1446_p12 }
 0x1b9   : > { %1358 = vrcp.f32 %v993_v28  ;;  %v1228_v12 = vmul.f32 -1.442695, %v965_v35 }
 0x1ba   : > { %1360 = vpow2.f32 %v1227_v42  ;;  %p1454_p11 = pnand %p1453_p9, %p1447_p13 }
 0x1bb   : > { %1362 = vpow2.f32 %v1228_v12 }
 0x1bd   : > { %v1349_v45 = vpop.eup %1348 }
 0x1be   : > { %v1351_v14 = vpop.eup %1350  ;;  %v998_v24 = vadd.f32 1.0, %v1349_v45 }
 0x1bf   : > { %v999_v59 = vadd.f32 1.0, %v1351_v14 }
 0x1c0   : > { %v1353_v60 = vpop.eup %1352  ;;  %1364 = vrcp.f32 %v998_v24 }
 0x1c1   : > { %v1355_v21 = vpop.eup %1354  ;;  %1366 = vrcp.f32 %v999_v59  ;;  %v994_v20 = vadd.f32 1.0, %v1353_v60 }
 0x1c2   : > { %v1357_v39 = vpop.eup %1356  ;;  %v995_v46 = vadd.f32 1.0, %v1355_v21 }
 0x1c3   : > { %v1359_v49 = vpop.eup %1358  ;;  %v1032_v40 = vmul.f32 %v1357_v39, %v1024_v56  ;;  %1368 = vrcp.f32 %v994_v20 }
 0x1c4   : > { %v1361_v48 = vpop.eup %1360  ;;  %v1033_v15 = vmul.f32 %v1359_v49, %v1025_v19  ;;  %1370 = vrcp.f32 %v995_v46 }
 0x1c5   : > { %v1363_v27 = vpop.eup %1362  ;;  %v1040_v32 = vadd.f32 %v1376_v44, %v1032_v40  ;;  %v996_v1 = vadd.f32 1.0, %v1361_v48 }
 0x1c6   : > { %v1041_v26 = vadd.f32 %v1377_v10, %v1033_v15  ;;  %v997_v6 = vadd.f32 1.0, %v1363_v27 }
 0x1c7   : > { %1048 = vst [vmem:[%s2292_s13] sm:$0xff] %v1040_v32  ;;  %1372 = vrcp.f32 %v996_v1 }
 0x1c8   : > { %1049 = vst [vmem:[%s2292_s13 + $0x8] sm:$0xff] %v1041_v26  ;;  %1374 = vrcp.f32 %v997_v6 }
 0x1ca   : > { %v1365_v3 = vpop.eup %1364 }
 0x1cb   : > { %v1367_v17 = vpop.eup %1366  ;;  %v1038_v0 = vmul.f32 %v1365_v3, %v1030_v22 }
 0x1cc   : > { %v1039_v31 = vmul.f32 %v1367_v17, %v1031_v13 }
 0x1cd   : > { %v1369_v33 = vpop.eup %1368  ;;  %v1046_v50 = vadd.f32 %v1378_v61, %v1038_v0 }
 0x1ce   : > { %v1371_v63 = vpop.eup %1370  ;;  %v1047_v4 = vadd.f32 %v1379_v52, %v1039_v31  ;;  %v1034_v11 = vmul.f32 %v1369_v33, %v1026_v62 }
 0x1cf   : > { %1054 = vst [vmem:[%s2292_s13 + $0x30] sm:$0xff] %v1046_v50  ;;  %v1035_v41 = vmul.f32 %v1371_v63, %v1027_v57 }
 0x1d0   : > { %1055 = vst [vmem:[%s2292_s13 + $0x38] sm:$0xff] %v1047_v4  ;;  %v1042_v2 = vadd.f32 %v1380_v18, %v1034_v11 }
 0x1d1   : > { %v1373_v36 = vpop.eup %1372  ;;  %v1043_v54 = vadd.f32 %v1381_v58, %v1035_v41 }
 0x1d2   : > { %v1375_v38 = vpop.eup %1374  ;;  %1050 = vst [vmem:[%s2292_s13 + $0x10] sm:$0xff] %v1042_v2  ;;  %v1036_v37 = vmul.f32 %v1373_v36, %v1028_v5 }
 0x1d3   : > { %1051 = vst [vmem:[%s2292_s13 + $0x18] sm:$0xff] %v1043_v54  ;;  %v1037_v55 = vmul.f32 %v1375_v38, %v1029_v47 }
 0x1d4   : > { %v1044_v43 = vadd.f32 %v1382_v8, %v1036_v37 }
 0x1d5   : > { %v1045_v29 = vadd.f32 %v1383_v9, %v1037_v55 }
 0x1d6   : > { %1052 = vst [vmem:[%s2292_s13 + $0x20] sm:$0xff] %v1044_v43 }
 0x1d7   : > { %1053 = vst [vmem:[%s2292_s13 + $0x28] sm:$0xff] %v1045_v29 }
 0x1d8   : > { %1457 = shalt.err (!%p1454_p11)
}
 0x1d9   : > { %s1458_s22 = scalar_lea.hbm %s2315_s25, 1024  ;;  %s1462_s12 = scalar_lea.hbm %s2373_s4, 2048 }
 0x1da   : > { %p1459_p1 = scmp.ne.s32.totalorder %s2315_s25, %s1458_s22  ;;  %p1463_p5 = scmp.lt.u32.totalorder %s2315_s25, %s2373_s4 }
 0x1db   : > { %p1464_p4 = scmp.lt.u32.totalorder %s1462_s12, %s1458_s22  ;;  %p1466_p0 = scmp.lt.u32.totalorder %s1458_s22, %s2315_s25 }
 0x1dc   : > { %p1460_p6 = pnand %p1459_p1, %p2460_p3 }
 0x1dd   : > { %p1465_p8 = por %p1464_p4, %p1463_p5 }
 0x1de   : > { %p1461_p2 = pneg %p1460_p6 }
 0x1df   : > { %p1467_p12 = por %p1466_p0, %p1465_p8 }
 0x1e1   : > { %p1468_p13 = pnand %p1467_p12, %p1461_p2 }
 0x1e3   : > { %1471 = shalt.err (!%p1468_p13)
}
 0x1e4   : > { %s1554_s5 = smov 256  }
 0x1e5   : > { %1243 = dma.vmem_to_hbm [thread:$0]  (%p2460_p3), %s2317_s8, 1024, %s2315_s25, %s1057_s18, %s1554_s5, %s1554_s5, %s1538_s27  }
 0x1e6 PF: > { %s1088_s9 = sand.u32 1, %s1510_s15   ;;  %p2461_p7 = scmp.ne.s32.totalorder %s2387_s30, 0 }
 0x1e7   : > { %p2462_p10 = scmp.ge.s32.totalorder %s1530_s20, 2  ;;  %s1089_s11 = scalar_lea.sflag [#allocation4], %s1088_s9 }
 0x1e9   : > { %p1253_p9 = pnand %p2462_p10, %p2461_p7 }
 0x1eb   : > { %1505 = dma.done.wait (!%p1253_p9), %s1089_s11, 1024  }
 0x1ec   : > { %1507 = vsyncadd (!%p1253_p9), %s1089_s11, 4294966272  ;;  %s23_s20 = sadd.s32 1, %s1530_s20   ;;  %s2463_s15 = smov %s1514_s16 }
 0x1ed   : > { %p20_p11 = scmp.ge.s32.totalorder %s23_s20, 4   ;;  %s2464_s16 = smov %s1518_s17 }
 0x1ee   : > { %s2465_s17 = smov %s1636_s29  ;;  %s2466_s18 = smov %s1526_s19 }
 0x1ef   : > { %s2467_s19 = smov %s2469_s23  ;;  %22 = sbr.rel (!%p20_p11) target bundleno = 8 (0x8), region = 104 }
 0x1f6   :  { %1094 = vsyncpa [#allocation3], 1 }
 0x1f7   :  { %1096 = vsyncpa [#allocation3 + $0x1], 1 }
 0x1f8   :  { %1097 = vsyncpa [#allocation6], 1 }
 0x1f9   :  { %1099 = vsyncpa [#allocation6 + $0x1], 1 }
 0x1fa   :  { %1100 = vsyncpa [#allocation4], 1 }
 0x1fb   :  { %1102 = vsyncpa [#allocation4 + $0x1], 1 }

</bundles_post_ra>
